<compile_context>
chip_gen: v7x
topology: tpu7x:2x2x1
jax: 0.10.0
libtpu: 0.0.40
codegen_flags: <defaults>
</compile_context>

<pallas_src>
import functools

import jax
import jax.numpy as jnp
import numpy as np
from jax import lax
from jax.experimental import pallas as pl
from jax.experimental.pallas import tpu as pltpu


def _round_up(x: int, m: int) -> int:
    return (x + m - 1) // m * m


# ---------------------------------------------------------------------------
# Feature probe: can resident operands be single-buffered (pl.Buffered(1))?
# The probe is a trivial kernel lowered + compiled once; any failure here only
# flips the buffering choice and cannot mask errors in the real kernel.
# ---------------------------------------------------------------------------
@functools.lru_cache(maxsize=None)
def _single_buffered_weights_supported() -> bool:
    def _probe(a_ref, o_ref):
        o_ref[...] = a_ref[...] * 2.0

    try:
        f = pl.pallas_call(
            _probe,
            out_shape=jax.ShapeDtypeStruct((8, 128), jnp.float32),
            grid=(1,),
            in_specs=[pl.BlockSpec((8, 128), lambda i: (0, 0),
                                   pipeline_mode=pl.Buffered(1))],
            out_specs=pl.BlockSpec((8, 128), lambda i: (0, 0)),
        )
        jax.jit(f).lower(jax.ShapeDtypeStruct((8, 128), jnp.float32)).compile()
        return True
    except Exception:
        return False


def _weight_spec(block_shape, index_map, single_buffer):
    """BlockSpec for a resident operand whose block index never changes."""
    if single_buffer:
        return pl.BlockSpec(block_shape, index_map, pipeline_mode=pl.Buffered(1))
    return pl.BlockSpec(block_shape, index_map)


# ---------------------------------------------------------------------------
# Fused GRU kernel.  One grid step == one (batch block, time chunk):
#   x_ref  : (Tc, TB, D)    time-major input chunk
#   wih_ref: (D, 3Hp)       resident input->hidden weights, gate order [r|z|n]
#   whh_ref: (Hp, 3Hp)      resident hidden->hidden weights
#   bih_ref: (1, 3Hp) f32   resident input bias
#   bhh_ref: (1, 3Hp) f32   resident hidden bias
#   out_ref: (TB, Hp)       final hidden state (written at the last time chunk)
#   gi_ref : (Tc, TB, 3Hp)  f32 VMEM scratch -- chunk-wide input gates
#   h_ref  : (TB, Hp)       f32 VMEM scratch -- h carry across time chunks
# ---------------------------------------------------------------------------
def _gru_fused_kernel(x_ref, wih_ref, whh_ref, bih_ref, bhh_ref, out_ref,
                      gi_ref, h_ref, *, seq_len):
    c = pl.program_id(1)                      # time-chunk index (innermost axis)
    t_chunk, tb, d = x_ref.shape
    hp = h_ref.shape[1]

    @pl.when(c == 0)
    def _():
        h_ref[...] = jnp.zeros_like(h_ref)

    # Chunk-wide, time-parallel input projection: one (Tc*TB, D) x (D, 3Hp) MXU
    # matmul instead of Tc skinny per-step matmuls.  gi stays in VMEM.
    x = x_ref[...].reshape(t_chunk * tb, d).astype(wih_ref.dtype)
    gi = jnp.dot(x, wih_ref[...], preferred_element_type=jnp.float32)
    gi_ref[...] = (gi + bih_ref[...]).reshape(t_chunk, tb, 3 * hp)

    # Hoisted out of the unrolled step loop (JAX does not CSE broadcast_in_dim).
    whh = whh_ref[...]
    bhh = jnp.broadcast_to(bhh_ref[...], (tb, 3 * hp))

    def step(i, h):
        gi_t = gi_ref[i]                                            # (TB, 3Hp) f32
        gh = jnp.dot(h.astype(whh.dtype), whh,
                     preferred_element_type=jnp.float32) + bhh
        r = jax.nn.sigmoid(gi_t[:, 0:hp] + gh[:, 0:hp])
        z = jax.nn.sigmoid(gi_t[:, hp:2 * hp] + gh[:, hp:2 * hp])
        n = jnp.tanh(gi_t[:, 2 * hp:] + r * gh[:, 2 * hp:])
        h_new = (1.0 - z) * n + z * h
        if seq_len % t_chunk != 0:
            # Only a ragged final chunk has padded timesteps: freeze h there.
            h_new = jnp.where(c * t_chunk + i < seq_len, h_new, h)
        return h_new

    h_final = lax.fori_loop(0, t_chunk, step, h_ref[...], unroll=True)
    h_ref[...] = h_final                      # VMEM carry, touched once per chunk

    @pl.when(c == pl.num_programs(1) - 1)
    def _():
        out_ref[...] = h_final.astype(out_ref.dtype)


# ---------------------------------------------------------------------------
# Parameter repacking -- do this ONCE at module init, not every forward.
# ---------------------------------------------------------------------------
def prepare_gru_params(w_ih, w_hh, b_ih, b_hh, *, param_dtype=jnp.float32):
    """Pad H -> multiple of 128, transpose to (K, 3Hp) gate-major layout, cast.

    PyTorch nn.GRU layout in: w_ih (3H, D), w_hh (3H, H), b_ih (3H,), b_hh (3H,),
    gate order [r, z, n].  Use param_dtype=jnp.bfloat16 at production sizes
    (D~600, H~1024) to halve weight DMA/VMEM and feed the bf16 MXU.
    """
    f32 = jnp.float32
    H = w_hh.shape[1]
    D = w_ih.shape[1]
    assert w_ih.shape == (3 * H, D) and w_hh.shape == (3 * H, H)
    Hp = _round_up(H, 128)

    w_ih3 = jnp.pad(jnp.asarray(w_ih, f32).reshape(3, H, D),
                    ((0, 0), (0, Hp - H), (0, 0)))
    w_hh3 = jnp.pad(jnp.asarray(w_hh, f32).reshape(3, H, H),
                    ((0, 0), (0, Hp - H), (0, Hp - H)))
    wih_t = w_ih3.transpose(2, 0, 1).reshape(D, 3 * Hp).astype(param_dtype)
    whh_t = w_hh3.transpose(2, 0, 1).reshape(Hp, 3 * Hp).astype(param_dtype)
    bih = jnp.pad(jnp.asarray(b_ih, f32).reshape(3, H),
                  ((0, 0), (0, Hp - H))).reshape(1, 3 * Hp)
    bhh = jnp.pad(jnp.asarray(b_hh, f32).reshape(3, H),
                  ((0, 0), (0, Hp - H))).reshape(1, 3 * Hp)
    return {"wih_t": wih_t, "whh_t": whh_t, "bih": bih, "bhh": bhh,
            "in_dim": D, "num_hid": H, "hid_padded": Hp}


def question_embedding_forward_packed(x, params, *, t_chunk=None):
    """QuestionEmbedding.forward(x) with pre-packed params.  Returns (B, H)."""
    B, T, D = x.shape
    assert D == params["in_dim"]
    H, Hp = params["num_hid"], params["hid_padded"]
    wih_t, whh_t = params["wih_t"], params["whh_t"]
    bih, bhh = params["bih"], params["bhh"]
    param_dtype = wih_t.dtype
    pbytes = jnp.dtype(param_dtype).itemsize
    f32 = jnp.float32

    Bp = _round_up(B, 8)
    # Batch split only when each half keeps MXU M >= 256: gives v7x's two
    # TensorCores parallel work while v5e/v6e (1 TC) keep full M per matmul.
    n_bblk = 2 if Bp >= 512 else 1
    TB = Bp // n_bblk

    if t_chunk is None:
        # Largest chunk (<= T) whose gi scratch (f32) + double-buffered x block
        # stays under ~24 MiB, so weights + output fit v7x's 64 MiB VMEM.
        per_t = TB * (3 * Hp * 4 + 2 * D * pbytes)
        t_chunk = max(1, min(T, (24 << 20) // max(per_t, 1)))
    Tc = t_chunk
    Tp = _round_up(T, Tc)
    n_chunks = Tp // Tc

    # Time-major, padded input (one cheap pass over x; x is far smaller than the
    # gi intermediate which now never touches HBM).
    x_tm = jnp.swapaxes(jnp.asarray(x, f32), 0, 1)               # (T, B, D)
    x_tm = jnp.pad(x_tm, ((0, Tp - T), (0, Bp - B), (0, 0))).astype(param_dtype)

    single_buf = _single_buffered_weights_supported()
    nbuf_w = 1 if single_buf else 2

    # Explicit VMEM budget for the compiler (review item: set it, don't comment it).
    est = (2 * Tc * TB * D * pbytes                 # x chunk, double-buffered
           + nbuf_w * (D + Hp) * 3 * Hp * pbytes    # W_ih + W_hh
           + nbuf_w * 2 * 3 * Hp * 4                # biases
           + 2 * TB * Hp * 4                        # output block
           + Tc * TB * 3 * Hp * 4                   # gi scratch
           + TB * Hp * 4)                           # h scratch
    vmem_limit = int(min(max(est * 3 // 2 + (2 << 20), 16 << 20), 64 << 20))

    kernel = functools.partial(_gru_fused_kernel, seq_len=T)

    # CORRECTNESS NOTE: the time axis MUST stay the innermost grid axis and MUST
    # be "arbitrary" -- the h carry in VMEM relies on row-major iteration over it.
    h_last = pl.pallas_call(
        kernel,
        out_shape=jax.ShapeDtypeStruct((Bp, Hp), f32),
        grid_spec=pltpu.PrefetchScalarGridSpec(
            num_scalar_prefetch=0,
            grid=(n_bblk, n_chunks),
            in_specs=[
                pl.BlockSpec((Tc, TB, D), lambda b, c: (c, b, 0)),
                _weight_spec((D, 3 * Hp), lambda b, c: (0, 0), single_buf),
                _weight_spec((Hp, 3 * Hp), lambda b, c: (0, 0), single_buf),
                _weight_spec((1, 3 * Hp), lambda b, c: (0, 0), single_buf),
                _weight_spec((1, 3 * Hp), lambda b, c: (0, 0), single_buf),
            ],
            out_specs=pl.BlockSpec((TB, Hp), lambda b, c: (b, 0)),
            scratch_shapes=[
                pltpu.VMEM((Tc, TB, 3 * Hp), jnp.float32),   # gi chunk
                pltpu.VMEM((TB, Hp), jnp.float32),           # h carry
            ],
        ),
        compiler_params=pltpu.CompilerParams(
            dimension_semantics=("parallel", "arbitrary"),
            vmem_limit_bytes=vmem_limit),
    )(x_tm, wih_t, whh_t, bih, bhh)

    return h_last[:B, :H]


def question_embedding_forward(x, w_ih, w_hh, b_ih, b_hh, *, t_chunk=None,
                               param_dtype=jnp.float32):
    """Convenience wrapper: repacks weights then runs the kernel.

    In a real model call prepare_gru_params() once at init and reuse the result.
    """
    params = prepare_gru_params(w_ih, w_hh, b_ih, b_hh, param_dtype=param_dtype)
    return question_embedding_forward_packed(x, params, t_chunk=t_chunk)


def gru_reference(x, w_ih, w_hh, b_ih, b_hh):
    """Pure-JAX reference (lax.scan) matching torch.nn.GRU semantics."""
    B, T, D = x.shape
    H = w_hh.shape[1]
    wih_t = w_ih.T
    whh_t = w_hh.T

    def step(h, x_t):
        gi = x_t @ wih_t + b_ih
        gh = h @ whh_t + b_hh
        i_r, i_z, i_n = gi[:, :H], gi[:, H:2 * H], gi[:, 2 * H:]
        h_r, h_z, h_n = gh[:, :H], gh[:, H:2 * H], gh[:, 2 * H:]
        r = jax.nn.sigmoid(i_r + h_r)
        z = jax.nn.sigmoid(i_z + h_z)
        n = jnp.tanh(i_n + r * h_n)
        return (1.0 - z) * n + z * h, None

    h0 = jnp.zeros((B, H), jnp.float32)
    h_last, _ = lax.scan(step, h0, jnp.swapaxes(x, 0, 1))
    return h_last


if __name__ == "__main__":
    # GRU, 1 layer, unidirectional, small shapes.
    batch, seq, in_dim, num_hid = 8, 8, 32, 32

    key = jax.random.PRNGKey(0)
    kx, k1, k2, k3, k4 = jax.random.split(key, 5)

    bound = 1.0 / np.sqrt(num_hid)
    w_ih = jax.random.uniform(k1, (3 * num_hid, in_dim), jnp.float32, -bound, bound)
    w_hh = jax.random.uniform(k2, (3 * num_hid, num_hid), jnp.float32, -bound, bound)
    b_ih = jax.random.uniform(k3, (3 * num_hid,), jnp.float32, -bound, bound)
    b_hh = jax.random.uniform(k4, (3 * num_hid,), jnp.float32, -bound, bound)

    x = jax.random.normal(kx, (batch, seq, in_dim), jnp.float32)

    params = prepare_gru_params(w_ih, w_hh, b_ih, b_hh)   # once, at "init"
    ref = jax.block_until_ready(gru_reference(x, w_ih, w_hh, b_ih, b_hh))

    # 1) Default chunking: whole sequence in one grid step per batch block.
    out = jax.block_until_ready(question_embedding_forward_packed(x, params))
    assert out.shape == (batch, num_hid)
    np.testing.assert_allclose(np.asarray(out), np.asarray(ref), rtol=1e-4, atol=1e-4)

    # 2) t_chunk=3: three ragged time chunks, exercising the cross-chunk VMEM
    #    h carry and the padded-timestep masking.
    out2 = jax.block_until_ready(
        question_embedding_forward_packed(x, params, t_chunk=3))
    np.testing.assert_allclose(np.asarray(out2), np.asarray(ref), rtol=1e-4, atol=1e-4)

    print("KERNEL_OK")
</pallas_src>

<mosaic_0001>
module attributes {stable_mosaic.version = 11 : i64} {
  func.func @_gru_fused_kernel(%arg0: i32, %arg1: i32, %arg2: memref<8x8x32xf32, #tpu.memory_space<vmem>>, %arg3: memref<32x384xf32, #tpu.memory_space<vmem>>, %arg4: memref<128x384xf32, #tpu.memory_space<vmem>>, %arg5: memref<1x384xf32, #tpu.memory_space<vmem>>, %arg6: memref<1x384xf32, #tpu.memory_space<vmem>>, %arg7: memref<8x128xf32, #tpu.memory_space<vmem>>, %arg8: memref<8x8x384xf32, #tpu.memory_space<vmem>>, %arg9: memref<8x128xf32, #tpu.memory_space<vmem>>) attributes {dimension_semantics = [#tpu.dimension_semantics<parallel>, #tpu.dimension_semantics<arbitrary>], iteration_bounds = array<i64: 1, 1>, scalar_prefetch = 0 : i64, scratch_operands = 2 : i64, tpu.core_type = #tpu.core_type<tc>, window_params = [{transform_indices = @transform_0, window_bounds = array<i64: 8, 8, 32>}, {pipeline_mode = #tpu.pipeline_mode<synchronous>, transform_indices = @transform_1, window_bounds = array<i64: 32, 384>}, {pipeline_mode = #tpu.pipeline_mode<synchronous>, transform_indices = @transform_2, window_bounds = array<i64: 128, 384>}, {pipeline_mode = #tpu.pipeline_mode<synchronous>, transform_indices = @transform_3, window_bounds = array<i64: 1, 384>}, {pipeline_mode = #tpu.pipeline_mode<synchronous>, transform_indices = @transform_4, window_bounds = array<i64: 1, 384>}, {transform_indices = @transform_5, window_bounds = array<i64: 8, 128>}]} {
    %c0_i32 = arith.constant 0 : i32
    %0 = arith.cmpi eq, %arg1, %c0_i32 : i32
    %1 = arith.extui %0 : i1 to i32
    %c0_i32_0 = arith.constant 0 : i32
    %2 = arith.cmpi ne, %1, %c0_i32_0 : i32
    scf.if %2 {
      %cst_69 = arith.constant 0.000000e+00 : f32
      %269 = vector.broadcast %cst_69 : f32 to vector<8x128xf32>
      %c0_70 = arith.constant 0 : index
      %c0_71 = arith.constant 0 : index
      %270 = vector.load %arg9[%c0_70, %c0_71] : memref<8x128xf32, #tpu.memory_space<vmem>>, vector<8x128xf32>
      tpu.vector_store %arg9[%c0_70, %c0_71], %269 {strides = array<i32>} : memref<8x128xf32, #tpu.memory_space<vmem>>, vector<8x128xf32>,
    } else {
    }
    %c0 = arith.constant 0 : index
    %c0_1 = arith.constant 0 : index
    %c0_2 = arith.constant 0 : index
    %3 = vector.load %arg2[%c0, %c0_1, %c0_2] : memref<8x8x32xf32, #tpu.memory_space<vmem>>, vector<8x8x32xf32>
    %4 = vector.shape_cast %3 : vector<8x8x32xf32> to vector<64x32xf32>
    %c0_3 = arith.constant 0 : index
    %c0_4 = arith.constant 0 : index
    %5 = vector.load %arg3[%c0_3, %c0_4] : memref<32x384xf32, #tpu.memory_space<vmem>>, vector<32x384xf32>
    %cst = arith.constant dense<0.000000e+00> : vector<64x384xf32>
    %6 = tpu.matmul %4, %5, %cst {dimension_numbers = #tpu.dot_dimension_numbers<[1], [0], [0], [1], [0, 0, 1, 1], [], []>} : vector<64x32xf32>, vector<32x384xf32>, vector<64x384xf32> -> vector<64x384xf32>
    %c0_5 = arith.constant 0 : index
    %c0_6 = arith.constant 0 : index
    %7 = vector.load %arg5[%c0_5, %c0_6] : memref<1x384xf32, #tpu.memory_space<vmem>>, vector<1x384xf32>
    %8 = vector.broadcast %7 : vector<1x384xf32> to vector<64x384xf32>
    %9 = arith.addf %6, %8 : vector<64x384xf32>
    %10 = vector.shape_cast %9 : vector<64x384xf32> to vector<8x8x384xf32>
    %c0_7 = arith.constant 0 : index
    %c0_8 = arith.constant 0 : index
    %c0_9 = arith.constant 0 : index
    %11 = vector.load %arg8[%c0_7, %c0_8, %c0_9] : memref<8x8x384xf32, #tpu.memory_space<vmem>>, vector<8x8x384xf32>
    tpu.vector_store %arg8[%c0_7, %c0_8, %c0_9], %10 {strides = array<i32>} : memref<8x8x384xf32, #tpu.memory_space<vmem>>, vector<8x8x384xf32>,
    %c0_10 = arith.constant 0 : index
    %c0_11 = arith.constant 0 : index
    %12 = vector.load %arg4[%c0_10, %c0_11] : memref<128x384xf32, #tpu.memory_space<vmem>>, vector<128x384xf32>
    %c0_12 = arith.constant 0 : index
    %c0_13 = arith.constant 0 : index
    %13 = vector.load %arg6[%c0_12, %c0_13] : memref<1x384xf32, #tpu.memory_space<vmem>>, vector<1x384xf32>
    %14 = vector.shape_cast %13 : vector<1x384xf32> to vector<1x384xf32>
    %15 = vector.broadcast %14 : vector<1x384xf32> to vector<8x384xf32>
    %c0_14 = arith.constant 0 : index
    %c0_15 = arith.constant 0 : index
    %16 = vector.load %arg9[%c0_14, %c0_15] : memref<8x128xf32, #tpu.memory_space<vmem>>, vector<8x128xf32>
    %c0_i32_16 = arith.constant 0 : i32
    %17 = arith.index_cast %c0_i32_16 : i32 to index
    %c0_17 = arith.constant 0 : index
    %c0_18 = arith.constant 0 : index
    %18 = vector.load %arg8[%17, %c0_17, %c0_18] : memref<8x8x384xf32, #tpu.memory_space<vmem>>, vector<1x8x384xf32>
    %19 = vector.shape_cast %18 : vector<1x8x384xf32> to vector<8x384xf32>
    %cst_19 = arith.constant dense<0.000000e+00> : vector<8x384xf32>
    %20 = tpu.matmul %16, %12, %cst_19 {dimension_numbers = #tpu.dot_dimension_numbers<[1], [0], [0], [1], [0, 0, 1, 1], [], []>} : vector<8x128xf32>, vector<128x384xf32>, vector<8x384xf32> -> vector<8x384xf32>
    %21 = arith.addf %20, %15 : vector<8x384xf32>
    %22 = vector.extract_strided_slice %19 {offsets = [0, 0], sizes = [8, 128], strides = [1, 1]} : vector<8x384xf32> to vector<8x128xf32>
    %23 = vector.extract_strided_slice %21 {offsets = [0, 0], sizes = [8, 128], strides = [1, 1]} : vector<8x384xf32> to vector<8x128xf32>
    %24 = arith.addf %22, %23 : vector<8x128xf32>
    %25 = arith.negf %24 : vector<8x128xf32>
    %26 = math.exp %25 : vector<8x128xf32>
    %cst_20 = arith.constant 1.000000e+00 : f32
    %27 = vector.broadcast %cst_20 : f32 to vector<8x128xf32>
    %28 = arith.addf %27, %26 : vector<8x128xf32>
    %29 = arith.divf %27, %28 : vector<8x128xf32>
    %30 = vector.extract_strided_slice %19 {offsets = [0, 128], sizes = [8, 128], strides = [1, 1]} : vector<8x384xf32> to vector<8x128xf32>
    %31 = vector.extract_strided_slice %21 {offsets = [0, 128], sizes = [8, 128], strides = [1, 1]} : vector<8x384xf32> to vector<8x128xf32>
    %32 = arith.addf %30, %31 : vector<8x128xf32>
    %33 = arith.negf %32 : vector<8x128xf32>
    %34 = math.exp %33 : vector<8x128xf32>
    %cst_21 = arith.constant 1.000000e+00 : f32
    %35 = vector.broadcast %cst_21 : f32 to vector<8x128xf32>
    %36 = arith.addf %35, %34 : vector<8x128xf32>
    %37 = arith.divf %35, %36 : vector<8x128xf32>
    %38 = vector.extract_strided_slice %19 {offsets = [0, 256], sizes = [8, 128], strides = [1, 1]} : vector<8x384xf32> to vector<8x128xf32>
    %39 = vector.extract_strided_slice %21 {offsets = [0, 256], sizes = [8, 128], strides = [1, 1]} : vector<8x384xf32> to vector<8x128xf32>
    %40 = arith.mulf %29, %39 : vector<8x128xf32>
    %41 = arith.addf %38, %40 : vector<8x128xf32>
    %42 = math.tanh %41 : vector<8x128xf32>
    %cst_22 = arith.constant 1.000000e+00 : f32
    %43 = vector.broadcast %cst_22 : f32 to vector<8x128xf32>
    %44 = arith.subf %43, %37 : vector<8x128xf32>
    %45 = arith.mulf %44, %42 : vector<8x128xf32>
    %46 = arith.mulf %37, %16 : vector<8x128xf32>
    %47 = arith.addf %45, %46 : vector<8x128xf32>
    %c1_i32 = arith.constant 1 : i32
    %48 = arith.index_cast %c1_i32 : i32 to index
    %c0_23 = arith.constant 0 : index
    %c0_24 = arith.constant 0 : index
    %49 = vector.load %arg8[%48, %c0_23, %c0_24] : memref<8x8x384xf32, #tpu.memory_space<vmem>>, vector<1x8x384xf32>
    %50 = vector.shape_cast %49 : vector<1x8x384xf32> to vector<8x384xf32>
    %cst_25 = arith.constant dense<0.000000e+00> : vector<8x384xf32>
    %51 = tpu.matmul %47, %12, %cst_25 {dimension_numbers = #tpu.dot_dimension_numbers<[1], [0], [0], [1], [0, 0, 1, 1], [], []>} : vector<8x128xf32>, vector<128x384xf32>, vector<8x384xf32> -> vector<8x384xf32>
    %52 = arith.addf %51, %15 : vector<8x384xf32>
    %53 = vector.extract_strided_slice %50 {offsets = [0, 0], sizes = [8, 128], strides = [1, 1]} : vector<8x384xf32> to vector<8x128xf32>
    %54 = vector.extract_strided_slice %52 {offsets = [0, 0], sizes = [8, 128], strides = [1, 1]} : vector<8x384xf32> to vector<8x128xf32>
    %55 = arith.addf %53, %54 : vector<8x128xf32>
    %56 = arith.negf %55 : vector<8x128xf32>
    %57 = math.exp %56 : vector<8x128xf32>
    %cst_26 = arith.constant 1.000000e+00 : f32
    %58 = vector.broadcast %cst_26 : f32 to vector<8x128xf32>
    %59 = arith.addf %58, %57 : vector<8x128xf32>
    %60 = arith.divf %58, %59 : vector<8x128xf32>
    %61 = vector.extract_strided_slice %50 {offsets = [0, 128], sizes = [8, 128], strides = [1, 1]} : vector<8x384xf32> to vector<8x128xf32>
    %62 = vector.extract_strided_slice %52 {offsets = [0, 128], sizes = [8, 128], strides = [1, 1]} : vector<8x384xf32> to vector<8x128xf32>
    %63 = arith.addf %61, %62 : vector<8x128xf32>
    %64 = arith.negf %63 : vector<8x128xf32>
    %65 = math.exp %64 : vector<8x128xf32>
    %cst_27 = arith.constant 1.000000e+00 : f32
    %66 = vector.broadcast %cst_27 : f32 to vector<8x128xf32>
    %67 = arith.addf %66, %65 : vector<8x128xf32>
    %68 = arith.divf %66, %67 : vector<8x128xf32>
    %69 = vector.extract_strided_slice %50 {offsets = [0, 256], sizes = [8, 128], strides = [1, 1]} : vector<8x384xf32> to vector<8x128xf32>
    %70 = vector.extract_strided_slice %52 {offsets = [0, 256], sizes = [8, 128], strides = [1, 1]} : vector<8x384xf32> to vector<8x128xf32>
    %71 = arith.mulf %60, %70 : vector<8x128xf32>
    %72 = arith.addf %69, %71 : vector<8x128xf32>
    %73 = math.tanh %72 : vector<8x128xf32>
    %cst_28 = arith.constant 1.000000e+00 : f32
    %74 = vector.broadcast %cst_28 : f32 to vector<8x128xf32>
    %75 = arith.subf %74, %68 : vector<8x128xf32>
    %76 = arith.mulf %75, %73 : vector<8x128xf32>
    %77 = arith.mulf %68, %47 : vector<8x128xf32>
    %78 = arith.addf %76, %77 : vector<8x128xf32>
    %c2_i32 = arith.constant 2 : i32
    %79 = arith.index_cast %c2_i32 : i32 to index
    %c0_29 = arith.constant 0 : index
    %c0_30 = arith.constant 0 : index
    %80 = vector.load %arg8[%79, %c0_29, %c0_30] : memref<8x8x384xf32, #tpu.memory_space<vmem>>, vector<1x8x384xf32>
    %81 = vector.shape_cast %80 : vector<1x8x384xf32> to vector<8x384xf32>
    %cst_31 = arith.constant dense<0.000000e+00> : vector<8x384xf32>
    %82 = tpu.matmul %78, %12, %cst_31 {dimension_numbers = #tpu.dot_dimension_numbers<[1], [0], [0], [1], [0, 0, 1, 1], [], []>} : vector<8x128xf32>, vector<128x384xf32>, vector<8x384xf32> -> vector<8x384xf32>
    %83 = arith.addf %82, %15 : vector<8x384xf32>
    %84 = vector.extract_strided_slice %81 {offsets = [0, 0], sizes = [8, 128], strides = [1, 1]} : vector<8x384xf32> to vector<8x128xf32>
    %85 = vector.extract_strided_slice %83 {offsets = [0, 0], sizes = [8, 128], strides = [1, 1]} : vector<8x384xf32> to vector<8x128xf32>
    %86 = arith.addf %84, %85 : vector<8x128xf32>
    %87 = arith.negf %86 : vector<8x128xf32>
    %88 = math.exp %87 : vector<8x128xf32>
    %cst_32 = arith.constant 1.000000e+00 : f32
    %89 = vector.broadcast %cst_32 : f32 to vector<8x128xf32>
    %90 = arith.addf %89, %88 : vector<8x128xf32>
    %91 = arith.divf %89, %90 : vector<8x128xf32>
    %92 = vector.extract_strided_slice %81 {offsets = [0, 128], sizes = [8, 128], strides = [1, 1]} : vector<8x384xf32> to vector<8x128xf32>
    %93 = vector.extract_strided_slice %83 {offsets = [0, 128], sizes = [8, 128], strides = [1, 1]} : vector<8x384xf32> to vector<8x128xf32>
    %94 = arith.addf %92, %93 : vector<8x128xf32>
    %95 = arith.negf %94 : vector<8x128xf32>
    %96 = math.exp %95 : vector<8x128xf32>
    %cst_33 = arith.constant 1.000000e+00 : f32
    %97 = vector.broadcast %cst_33 : f32 to vector<8x128xf32>
    %98 = arith.addf %97, %96 : vector<8x128xf32>
    %99 = arith.divf %97, %98 : vector<8x128xf32>
    %100 = vector.extract_strided_slice %81 {offsets = [0, 256], sizes = [8, 128], strides = [1, 1]} : vector<8x384xf32> to vector<8x128xf32>
    %101 = vector.extract_strided_slice %83 {offsets = [0, 256], sizes = [8, 128], strides = [1, 1]} : vector<8x384xf32> to vector<8x128xf32>
    %102 = arith.mulf %91, %101 : vector<8x128xf32>
    %103 = arith.addf %100, %102 : vector<8x128xf32>
    %104 = math.tanh %103 : vector<8x128xf32>
    %cst_34 = arith.constant 1.000000e+00 : f32
    %105 = vector.broadcast %cst_34 : f32 to vector<8x128xf32>
    %106 = arith.subf %105, %99 : vector<8x128xf32>
    %107 = arith.mulf %106, %104 : vector<8x128xf32>
    %108 = arith.mulf %99, %78 : vector<8x128xf32>
    %109 = arith.addf %107, %108 : vector<8x128xf32>
    %c3_i32 = arith.constant 3 : i32
    %110 = arith.index_cast %c3_i32 : i32 to index
    %c0_35 = arith.constant 0 : index
    %c0_36 = arith.constant 0 : index
    %111 = vector.load %arg8[%110, %c0_35, %c0_36] : memref<8x8x384xf32, #tpu.memory_space<vmem>>, vector<1x8x384xf32>
    %112 = vector.shape_cast %111 : vector<1x8x384xf32> to vector<8x384xf32>
    %cst_37 = arith.constant dense<0.000000e+00> : vector<8x384xf32>
    %113 = tpu.matmul %109, %12, %cst_37 {dimension_numbers = #tpu.dot_dimension_numbers<[1], [0], [0], [1], [0, 0, 1, 1], [], []>} : vector<8x128xf32>, vector<128x384xf32>, vector<8x384xf32> -> vector<8x384xf32>
    %114 = arith.addf %113, %15 : vector<8x384xf32>
    %115 = vector.extract_strided_slice %112 {offsets = [0, 0], sizes = [8, 128], strides = [1, 1]} : vector<8x384xf32> to vector<8x128xf32>
    %116 = vector.extract_strided_slice %114 {offsets = [0, 0], sizes = [8, 128], strides = [1, 1]} : vector<8x384xf32> to vector<8x128xf32>
    %117 = arith.addf %115, %116 : vector<8x128xf32>
    %118 = arith.negf %117 : vector<8x128xf32>
    %119 = math.exp %118 : vector<8x128xf32>
    %cst_38 = arith.constant 1.000000e+00 : f32
    %120 = vector.broadcast %cst_38 : f32 to vector<8x128xf32>
    %121 = arith.addf %120, %119 : vector<8x128xf32>
    %122 = arith.divf %120, %121 : vector<8x128xf32>
    %123 = vector.extract_strided_slice %112 {offsets = [0, 128], sizes = [8, 128], strides = [1, 1]} : vector<8x384xf32> to vector<8x128xf32>
    %124 = vector.extract_strided_slice %114 {offsets = [0, 128], sizes = [8, 128], strides = [1, 1]} : vector<8x384xf32> to vector<8x128xf32>
    %125 = arith.addf %123, %124 : vector<8x128xf32>
    %126 = arith.negf %125 : vector<8x128xf32>
    %127 = math.exp %126 : vector<8x128xf32>
    %cst_39 = arith.constant 1.000000e+00 : f32
    %128 = vector.broadcast %cst_39 : f32 to vector<8x128xf32>
    %129 = arith.addf %128, %127 : vector<8x128xf32>
    %130 = arith.divf %128, %129 : vector<8x128xf32>
    %131 = vector.extract_strided_slice %112 {offsets = [0, 256], sizes = [8, 128], strides = [1, 1]} : vector<8x384xf32> to vector<8x128xf32>
    %132 = vector.extract_strided_slice %114 {offsets = [0, 256], sizes = [8, 128], strides = [1, 1]} : vector<8x384xf32> to vector<8x128xf32>
    %133 = arith.mulf %122, %132 : vector<8x128xf32>
    %134 = arith.addf %131, %133 : vector<8x128xf32>
    %135 = math.tanh %134 : vector<8x128xf32>
    %cst_40 = arith.constant 1.000000e+00 : f32
    %136 = vector.broadcast %cst_40 : f32 to vector<8x128xf32>
    %137 = arith.subf %136, %130 : vector<8x128xf32>
    %138 = arith.mulf %137, %135 : vector<8x128xf32>
    %139 = arith.mulf %130, %109 : vector<8x128xf32>
    %140 = arith.addf %138, %139 : vector<8x128xf32>
    %c4_i32 = arith.constant 4 : i32
    %141 = arith.index_cast %c4_i32 : i32 to index
    %c0_41 = arith.constant 0 : index
    %c0_42 = arith.constant 0 : index
    %142 = vector.load %arg8[%141, %c0_41, %c0_42] : memref<8x8x384xf32, #tpu.memory_space<vmem>>, vector<1x8x384xf32>
    %143 = vector.shape_cast %142 : vector<1x8x384xf32> to vector<8x384xf32>
    %cst_43 = arith.constant dense<0.000000e+00> : vector<8x384xf32>
    %144 = tpu.matmul %140, %12, %cst_43 {dimension_numbers = #tpu.dot_dimension_numbers<[1], [0], [0], [1], [0, 0, 1, 1], [], []>} : vector<8x128xf32>, vector<128x384xf32>, vector<8x384xf32> -> vector<8x384xf32>
    %145 = arith.addf %144, %15 : vector<8x384xf32>
    %146 = vector.extract_strided_slice %143 {offsets = [0, 0], sizes = [8, 128], strides = [1, 1]} : vector<8x384xf32> to vector<8x128xf32>
    %147 = vector.extract_strided_slice %145 {offsets = [0, 0], sizes = [8, 128], strides = [1, 1]} : vector<8x384xf32> to vector<8x128xf32>
    %148 = arith.addf %146, %147 : vector<8x128xf32>
    %149 = arith.negf %148 : vector<8x128xf32>
    %150 = math.exp %149 : vector<8x128xf32>
    %cst_44 = arith.constant 1.000000e+00 : f32
    %151 = vector.broadcast %cst_44 : f32 to vector<8x128xf32>
    %152 = arith.addf %151, %150 : vector<8x128xf32>
    %153 = arith.divf %151, %152 : vector<8x128xf32>
    %154 = vector.extract_strided_slice %143 {offsets = [0, 128], sizes = [8, 128], strides = [1, 1]} : vector<8x384xf32> to vector<8x128xf32>
    %155 = vector.extract_strided_slice %145 {offsets = [0, 128], sizes = [8, 128], strides = [1, 1]} : vector<8x384xf32> to vector<8x128xf32>
    %156 = arith.addf %154, %155 : vector<8x128xf32>
    %157 = arith.negf %156 : vector<8x128xf32>
    %158 = math.exp %157 : vector<8x128xf32>
    %cst_45 = arith.constant 1.000000e+00 : f32
    %159 = vector.broadcast %cst_45 : f32 to vector<8x128xf32>
    %160 = arith.addf %159, %158 : vector<8x128xf32>
    %161 = arith.divf %159, %160 : vector<8x128xf32>
    %162 = vector.extract_strided_slice %143 {offsets = [0, 256], sizes = [8, 128], strides = [1, 1]} : vector<8x384xf32> to vector<8x128xf32>
    %163 = vector.extract_strided_slice %145 {offsets = [0, 256], sizes = [8, 128], strides = [1, 1]} : vector<8x384xf32> to vector<8x128xf32>
    %164 = arith.mulf %153, %163 : vector<8x128xf32>
    %165 = arith.addf %162, %164 : vector<8x128xf32>
    %166 = math.tanh %165 : vector<8x128xf32>
    %cst_46 = arith.constant 1.000000e+00 : f32
    %167 = vector.broadcast %cst_46 : f32 to vector<8x128xf32>
    %168 = arith.subf %167, %161 : vector<8x128xf32>
    %169 = arith.mulf %168, %166 : vector<8x128xf32>
    %170 = arith.mulf %161, %140 : vector<8x128xf32>
    %171 = arith.addf %169, %170 : vector<8x128xf32>
    %c5_i32 = arith.constant 5 : i32
    %172 = arith.index_cast %c5_i32 : i32 to index
    %c0_47 = arith.constant 0 : index
    %c0_48 = arith.constant 0 : index
    %173 = vector.load %arg8[%172, %c0_47, %c0_48] : memref<8x8x384xf32, #tpu.memory_space<vmem>>, vector<1x8x384xf32>
    %174 = vector.shape_cast %173 : vector<1x8x384xf32> to vector<8x384xf32>
    %cst_49 = arith.constant dense<0.000000e+00> : vector<8x384xf32>
    %175 = tpu.matmul %171, %12, %cst_49 {dimension_numbers = #tpu.dot_dimension_numbers<[1], [0], [0], [1], [0, 0, 1, 1], [], []>} : vector<8x128xf32>, vector<128x384xf32>, vector<8x384xf32> -> vector<8x384xf32>
    %176 = arith.addf %175, %15 : vector<8x384xf32>
    %177 = vector.extract_strided_slice %174 {offsets = [0, 0], sizes = [8, 128], strides = [1, 1]} : vector<8x384xf32> to vector<8x128xf32>
    %178 = vector.extract_strided_slice %176 {offsets = [0, 0], sizes = [8, 128], strides = [1, 1]} : vector<8x384xf32> to vector<8x128xf32>
    %179 = arith.addf %177, %178 : vector<8x128xf32>
    %180 = arith.negf %179 : vector<8x128xf32>
    %181 = math.exp %180 : vector<8x128xf32>
    %cst_50 = arith.constant 1.000000e+00 : f32
    %182 = vector.broadcast %cst_50 : f32 to vector<8x128xf32>
    %183 = arith.addf %182, %181 : vector<8x128xf32>
    %184 = arith.divf %182, %183 : vector<8x128xf32>
    %185 = vector.extract_strided_slice %174 {offsets = [0, 128], sizes = [8, 128], strides = [1, 1]} : vector<8x384xf32> to vector<8x128xf32>
    %186 = vector.extract_strided_slice %176 {offsets = [0, 128], sizes = [8, 128], strides = [1, 1]} : vector<8x384xf32> to vector<8x128xf32>
    %187 = arith.addf %185, %186 : vector<8x128xf32>
    %188 = arith.negf %187 : vector<8x128xf32>
    %189 = math.exp %188 : vector<8x128xf32>
    %cst_51 = arith.constant 1.000000e+00 : f32
    %190 = vector.broadcast %cst_51 : f32 to vector<8x128xf32>
    %191 = arith.addf %190, %189 : vector<8x128xf32>
    %192 = arith.divf %190, %191 : vector<8x128xf32>
    %193 = vector.extract_strided_slice %174 {offsets = [0, 256], sizes = [8, 128], strides = [1, 1]} : vector<8x384xf32> to vector<8x128xf32>
    %194 = vector.extract_strided_slice %176 {offsets = [0, 256], sizes = [8, 128], strides = [1, 1]} : vector<8x384xf32> to vector<8x128xf32>
    %195 = arith.mulf %184, %194 : vector<8x128xf32>
    %196 = arith.addf %193, %195 : vector<8x128xf32>
    %197 = math.tanh %196 : vector<8x128xf32>
    %cst_52 = arith.constant 1.000000e+00 : f32
    %198 = vector.broadcast %cst_52 : f32 to vector<8x128xf32>
    %199 = arith.subf %198, %192 : vector<8x128xf32>
    %200 = arith.mulf %199, %197 : vector<8x128xf32>
    %201 = arith.mulf %192, %171 : vector<8x128xf32>
    %202 = arith.addf %200, %201 : vector<8x128xf32>
    %c6_i32 = arith.constant 6 : i32
    %203 = arith.index_cast %c6_i32 : i32 to index
    %c0_53 = arith.constant 0 : index
    %c0_54 = arith.constant 0 : index
    %204 = vector.load %arg8[%203, %c0_53, %c0_54] : memref<8x8x384xf32, #tpu.memory_space<vmem>>, vector<1x8x384xf32>
    %205 = vector.shape_cast %204 : vector<1x8x384xf32> to vector<8x384xf32>
    %cst_55 = arith.constant dense<0.000000e+00> : vector<8x384xf32>
    %206 = tpu.matmul %202, %12, %cst_55 {dimension_numbers = #tpu.dot_dimension_numbers<[1], [0], [0], [1], [0, 0, 1, 1], [], []>} : vector<8x128xf32>, vector<128x384xf32>, vector<8x384xf32> -> vector<8x384xf32>
    %207 = arith.addf %206, %15 : vector<8x384xf32>
    %208 = vector.extract_strided_slice %205 {offsets = [0, 0], sizes = [8, 128], strides = [1, 1]} : vector<8x384xf32> to vector<8x128xf32>
    %209 = vector.extract_strided_slice %207 {offsets = [0, 0], sizes = [8, 128], strides = [1, 1]} : vector<8x384xf32> to vector<8x128xf32>
    %210 = arith.addf %208, %209 : vector<8x128xf32>
    %211 = arith.negf %210 : vector<8x128xf32>
    %212 = math.exp %211 : vector<8x128xf32>
    %cst_56 = arith.constant 1.000000e+00 : f32
    %213 = vector.broadcast %cst_56 : f32 to vector<8x128xf32>
    %214 = arith.addf %213, %212 : vector<8x128xf32>
    %215 = arith.divf %213, %214 : vector<8x128xf32>
    %216 = vector.extract_strided_slice %205 {offsets = [0, 128], sizes = [8, 128], strides = [1, 1]} : vector<8x384xf32> to vector<8x128xf32>
    %217 = vector.extract_strided_slice %207 {offsets = [0, 128], sizes = [8, 128], strides = [1, 1]} : vector<8x384xf32> to vector<8x128xf32>
    %218 = arith.addf %216, %217 : vector<8x128xf32>
    %219 = arith.negf %218 : vector<8x128xf32>
    %220 = math.exp %219 : vector<8x128xf32>
    %cst_57 = arith.constant 1.000000e+00 : f32
    %221 = vector.broadcast %cst_57 : f32 to vector<8x128xf32>
    %222 = arith.addf %221, %220 : vector<8x128xf32>
    %223 = arith.divf %221, %222 : vector<8x128xf32>
    %224 = vector.extract_strided_slice %205 {offsets = [0, 256], sizes = [8, 128], strides = [1, 1]} : vector<8x384xf32> to vector<8x128xf32>
    %225 = vector.extract_strided_slice %207 {offsets = [0, 256], sizes = [8, 128], strides = [1, 1]} : vector<8x384xf32> to vector<8x128xf32>
    %226 = arith.mulf %215, %225 : vector<8x128xf32>
    %227 = arith.addf %224, %226 : vector<8x128xf32>
    %228 = math.tanh %227 : vector<8x128xf32>
    %cst_58 = arith.constant 1.000000e+00 : f32
    %229 = vector.broadcast %cst_58 : f32 to vector<8x128xf32>
    %230 = arith.subf %229, %223 : vector<8x128xf32>
    %231 = arith.mulf %230, %228 : vector<8x128xf32>
    %232 = arith.mulf %223, %202 : vector<8x128xf32>
    %233 = arith.addf %231, %232 : vector<8x128xf32>
    %c7_i32 = arith.constant 7 : i32
    %234 = arith.index_cast %c7_i32 : i32 to index
    %c0_59 = arith.constant 0 : index
    %c0_60 = arith.constant 0 : index
    %235 = vector.load %arg8[%234, %c0_59, %c0_60] : memref<8x8x384xf32, #tpu.memory_space<vmem>>, vector<1x8x384xf32>
    %236 = vector.shape_cast %235 : vector<1x8x384xf32> to vector<8x384xf32>
    %cst_61 = arith.constant dense<0.000000e+00> : vector<8x384xf32>
    %237 = tpu.matmul %233, %12, %cst_61 {dimension_numbers = #tpu.dot_dimension_numbers<[1], [0], [0], [1], [0, 0, 1, 1], [], []>} : vector<8x128xf32>, vector<128x384xf32>, vector<8x384xf32> -> vector<8x384xf32>
    %238 = arith.addf %237, %15 : vector<8x384xf32>
    %239 = vector.extract_strided_slice %236 {offsets = [0, 0], sizes = [8, 128], strides = [1, 1]} : vector<8x384xf32> to vector<8x128xf32>
    %240 = vector.extract_strided_slice %238 {offsets = [0, 0], sizes = [8, 128], strides = [1, 1]} : vector<8x384xf32> to vector<8x128xf32>
    %241 = arith.addf %239, %240 : vector<8x128xf32>
    %242 = arith.negf %241 : vector<8x128xf32>
    %243 = math.exp %242 : vector<8x128xf32>
    %cst_62 = arith.constant 1.000000e+00 : f32
    %244 = vector.broadcast %cst_62 : f32 to vector<8x128xf32>
    %245 = arith.addf %244, %243 : vector<8x128xf32>
    %246 = arith.divf %244, %245 : vector<8x128xf32>
    %247 = vector.extract_strided_slice %236 {offsets = [0, 128], sizes = [8, 128], strides = [1, 1]} : vector<8x384xf32> to vector<8x128xf32>
    %248 = vector.extract_strided_slice %238 {offsets = [0, 128], sizes = [8, 128], strides = [1, 1]} : vector<8x384xf32> to vector<8x128xf32>
    %249 = arith.addf %247, %248 : vector<8x128xf32>
    %250 = arith.negf %249 : vector<8x128xf32>
    %251 = math.exp %250 : vector<8x128xf32>
    %cst_63 = arith.constant 1.000000e+00 : f32
    %252 = vector.broadcast %cst_63 : f32 to vector<8x128xf32>
    %253 = arith.addf %252, %251 : vector<8x128xf32>
    %254 = arith.divf %252, %253 : vector<8x128xf32>
    %255 = vector.extract_strided_slice %236 {offsets = [0, 256], sizes = [8, 128], strides = [1, 1]} : vector<8x384xf32> to vector<8x128xf32>
    %256 = vector.extract_strided_slice %238 {offsets = [0, 256], sizes = [8, 128], strides = [1, 1]} : vector<8x384xf32> to vector<8x128xf32>
    %257 = arith.mulf %246, %256 : vector<8x128xf32>
    %258 = arith.addf %255, %257 : vector<8x128xf32>
    %259 = math.tanh %258 : vector<8x128xf32>
    %cst_64 = arith.constant 1.000000e+00 : f32
    %260 = vector.broadcast %cst_64 : f32 to vector<8x128xf32>
    %261 = arith.subf %260, %254 : vector<8x128xf32>
    %262 = arith.mulf %261, %259 : vector<8x128xf32>
    %263 = arith.mulf %254, %233 : vector<8x128xf32>
    %264 = arith.addf %262, %263 : vector<8x128xf32>
    %c8_i32 = arith.constant 8 : i32
    %c0_65 = arith.constant 0 : index
    %c0_66 = arith.constant 0 : index
    %265 = vector.load %arg9[%c0_65, %c0_66] : memref<8x128xf32, #tpu.memory_space<vmem>>, vector<8x128xf32>
    tpu.vector_store %arg9[%c0_65, %c0_66], %264 {strides = array<i32>} : memref<8x128xf32, #tpu.memory_space<vmem>>, vector<8x128xf32>,
    %c0_i32_67 = arith.constant 0 : i32
    %266 = arith.cmpi eq, %arg1, %c0_i32_67 : i32
    %267 = arith.extui %266 : i1 to i32
    %c0_i32_68 = arith.constant 0 : i32
    %268 = arith.cmpi ne, %267, %c0_i32_68 : i32
    scf.if %268 {
      %c0_69 = arith.constant 0 : index
      %c0_70 = arith.constant 0 : index
      %269 = vector.load %arg7[%c0_69, %c0_70] : memref<8x128xf32, #tpu.memory_space<vmem>>, vector<8x128xf32>
      tpu.vector_store %arg7[%c0_69, %c0_70], %264 {strides = array<i32>} : memref<8x128xf32, #tpu.memory_space<vmem>>, vector<8x128xf32>,
    } else {
    }
    return
  }
  func.func @transform_0(%arg0: i32, %arg1: i32) -> (i32, i32, i32) {
    %c0_i32 = arith.constant 0 : i32
    %c0_i32_0 = arith.constant 0 : i32
    return %arg1, %arg0, %c0_i32 : i32, i32, i32
  }
  func.func @transform_1(%arg0: i32, %arg1: i32) -> (i32, i32) {
    %c0_i32 = arith.constant 0 : i32
    %c0_i32_0 = arith.constant 0 : i32
    %c0_i32_1 = arith.constant 0 : i32
    return %c0_i32, %c0_i32_0 : i32, i32
  }
  func.func @transform_2(%arg0: i32, %arg1: i32) -> (i32, i32) {
    %c0_i32 = arith.constant 0 : i32
    %c0_i32_0 = arith.constant 0 : i32
    %c0_i32_1 = arith.constant 0 : i32
    return %c0_i32, %c0_i32_0 : i32, i32
  }
  func.func @transform_3(%arg0: i32, %arg1: i32) -> (i32, i32) {
    %c0_i32 = arith.constant 0 : i32
    %c0_i32_0 = arith.constant 0 : i32
    %c0_i32_1 = arith.constant 0 : i32
    return %c0_i32, %c0_i32_0 : i32, i32
  }
  func.func @transform_4(%arg0: i32, %arg1: i32) -> (i32, i32) {
    %c0_i32 = arith.constant 0 : i32
    %c0_i32_0 = arith.constant 0 : i32
    %c0_i32_1 = arith.constant 0 : i32
    return %c0_i32, %c0_i32_0 : i32, i32
  }
  func.func @transform_5(%arg0: i32, %arg1: i32) -> (i32, i32) {
    %c0_i32 = arith.constant 0 : i32
    %c0_i32_0 = arith.constant 0 : i32
    return %arg0, %c0_i32 : i32, i32
  }
}

</mosaic_0001>

<bundles_post_ra>
// kernel: tpu_custom_call.1
= control target key start
LH: loop header
LB: loop body
LE: loop exit
PB: predicated region body
PF: predicated region fallthrough
CT: control target
= control target key end

     0   :  { %10 = vsyncpa [#allocation5], 0  ;;  %s3468_s0 = inlined_call_operand.hbm [shape: f32[8,8,32], index: 0, kind: input, shape index: {}]   ;;  %s3469_s1 = inlined_call_operand.hbm [shape: f32[32,384], index: 1, kind: input, shape index: {}]   ;;  %s3470_s2 = inlined_call_operand.hbm [shape: f32[128,384], index: 2, kind: input, shape index: {}]   ;;  %s3471_s3 = inlined_call_operand.vmem [shape: f32[1,384], index: 3, kind: input, shape index: {}]   ;;  %s3472_s4 = inlined_call_operand.vmem [shape: f32[1,384], index: 4, kind: input, shape index: {}]   ;;  %s3473_s5 = inlined_call_operand.hbm [shape: f32[8,128], index: 5, kind: output, shape index: {}]  }
   0x1   :  { %11 = vsyncpa [#allocation8], 0 }
   0x2   :  { %12 = vsyncpa [#allocation6], 0  ;;  %s2962_s18 = smov [#allocation7]   ;;  %s2868_s22 = scalar_lea.hbm %s3469_s1, 1536 }
   0x3   :  { %s30_s19 = sshll.u32 %s2962_s18, 4  ;;  %p2869_p0 = scmp.ne.s32.totalorder %s3469_s1, %s2868_s22  ;;  %s31_s19 = int_to_ptr.vmem [resolvable:$true] %s30_s19 }
   0x4   :  { %p2872_p1 = scmp.lt.u32.totalorder %s2868_s22, %s3469_s1 }
   0x6   :  { %p2874_p2 = pnand %p2872_p1, %p2869_p0 }
   0x8   :  { %2877 = shalt.err (!%p2874_p2)
}
   0x9   :  { %s2878_s27 = scalar_lea.vmem %s31_s19, 1536  ;;  %p2883_p4 = scmp.lt.s32.totalorder %s31_s19, %s31_s19 }
   0xa   :  { %p2879_p3 = scmp.ne.s32.totalorder %s31_s19, %s2878_s27  ;;  %p2884_p5 = scmp.lt.s32.totalorder %s2878_s27, %s2878_s27 }
   0xc   :  { %p2885_p6 = por %p2884_p5, %p2883_p4 }
   0xe   :  { %p2886_p7 = pnand %p2885_p6, %p2879_p3 }
  0x10   :  { %2889 = shalt.err (!%p2886_p7)
}
  0x11   :  { %s2963_s28 = smov 384   ;;  %s2964_s29 = smov 24  }
  0x12   :  { %36 = dma.hbm_to_vmem [thread:$0]  %s3469_s1, 1536, %s31_s19, [#allocation8], %s2963_s28, %s2963_s28, %s2964_s29  }
  0x13   :  { %s2965_s7 = smov [#allocation4]   ;;  %s2890_s11 = scalar_lea.hbm %s3468_s0, 1024 }
  0x14   :  { %s18_s8 = sshll.u32 %s2965_s7, 4  ;;  %p2891_p8 = scmp.ne.s32.totalorder %s3468_s0, %s2890_s11  ;;  %s19_s8 = int_to_ptr.vmem [resolvable:$true] %s18_s8 }
  0x15   :  { %p2894_p9 = scmp.lt.u32.totalorder %s2890_s11, %s3468_s0 }
  0x17   :  { %p2896_p10 = pnand %p2894_p9, %p2891_p8 }
  0x19   :  { %2899 = shalt.err (!%p2896_p10)
}
  0x1a   :  { %s2900_s16 = scalar_lea.vmem %s19_s8, 1024  ;;  %p2905_p12 = scmp.lt.s32.totalorder %s19_s8, %s19_s8 }
  0x1b   :  { %p2901_p11 = scmp.ne.s32.totalorder %s19_s8, %s2900_s16  ;;  %p2906_p13 = scmp.lt.s32.totalorder %s2900_s16, %s2900_s16 }
  0x1d   :  { %p2907_p0 = por %p2906_p13, %p2905_p12 }
  0x1f   :  { %p2908_p1 = pnand %p2907_p0, %p2901_p11 }
  0x21   :  { %2911 = shalt.err (!%p2908_p1)
}
  0x22   :  { %s2966_s1 = smov 128   ;;  %s2967_s17 = smov 8  }
  0x23   :  { %24 = dma.hbm_to_vmem [thread:$0]  %s3468_s0, 1024, %s19_s8, [#allocation5], %s2966_s1, %s2966_s1, %s2967_s17  }
  0x24   :  { %s2968_s20 = smov [#allocation9]   ;;  %s2912_s24 = scalar_lea.hbm %s3470_s2, 6144 }
  0x25   :  { %s42_s21 = sshll.u32 %s2968_s20, 4  ;;  %p2913_p2 = scmp.ne.s32.totalorder %s3470_s2, %s2912_s24  ;;  %s43_s21 = int_to_ptr.vmem [resolvable:$true] %s42_s21 }
  0x26   :  { %p2916_p3 = scmp.lt.u32.totalorder %s2912_s24, %s3470_s2 }
  0x28   :  { %p2918_p4 = pnand %p2916_p3, %p2913_p2 }
  0x2a   :  { %2921 = shalt.err (!%p2918_p4)
}
  0x2b   :  { %s2922_s6 = scalar_lea.vmem %s43_s21, 6144  ;;  %p2927_p6 = scmp.lt.s32.totalorder %s43_s21, %s43_s21 }
  0x2c   :  { %p2923_p5 = scmp.ne.s32.totalorder %s43_s21, %s2922_s6  ;;  %p2928_p7 = scmp.lt.s32.totalorder %s2922_s6, %s2922_s6 }
  0x2e   :  { %p2929_p8 = por %p2928_p7, %p2927_p6 }
  0x30   :  { %p2930_p9 = pnand %p2929_p8, %p2923_p5 }
  0x32   :  { %2933 = shalt.err (!%p2930_p9)
}
  0x33   :  { %48 = dma.hbm_to_vmem [thread:$0]  %s3470_s2, 6144, %s43_s21, [#allocation8], %s2963_s28, %s2963_s28, %s2964_s29  }
  0x34   :  { %2956 = dma.done.wait [#allocation5], 1024  }
  0x35   :  { %2957 = vsyncadd [#allocation5], 4294966272 }
  0x36   :  { %2958 = dma.done.wait [#allocation8], 7680  }
  0x37   :  { %2959 = vsyncadd [#allocation8], 4294959616  ;;  %v2969_v0 = vmov 0.0   ;;  %v76_v1 = vld [vmem:[#allocation7 + $0x8] sm:$0xff]  ;;  %v79_v2 = vld [vmem:[#allocation7 + $0x20] sm:$0xff]  ;;  %vm104_vm0 = vcmask 261120  }
  0x38   :  { %193 = vmatprep.mubr.f32.mxu0 %v2969_v0  ;;  %v75_v3 = vld [vmem:[#allocation7] sm:$0xff]  ;;  %v2265_v4 = vpack.c.bf16 %v79_v2, %v76_v1  ;;  %v78_v5 = vld [vmem:[#allocation7 + $0x18] sm:$0xff]  ;;  %v85_v7 = vld [vmem:[#allocation7 + $0x50] sm:$0xff]  ;;  %v2970_v57 = vmov 0.0|0.0   ;;  %vm2971_vm1 = vmmov 0  }
  0x39   :  { %v82_v6 = vld [vmem:[#allocation7 + $0x38] sm:$0xff]  ;;  %v2267_v8 = vpack.c.bf16 %v78_v5, %v75_v3  ;;  %v81_v10 = vld [vmem:[#allocation7 + $0x30] sm:$0xff]  ;;  %v84_v11 = vld [vmem:[#allocation7 + $0x48] sm:$0xff] }
  0x3a   :  { %v2269_v9 = vpack.c.bf16 %v85_v7, %v82_v6  ;;  %v67_v12 = vld [vmem:[#allocation4] sm:$0xff]  ;;  %2266 = vmatprep.subr.bf16.mxu0 %v2265_v4  ;;  %v372_v13 = vld [vmem:[#allocation9 + $0x8] sm:$0xff]  ;;  %v2271_v15 = vpack.c.bf16 %v84_v11, %v81_v10  ;;  %v374_v18 = vld [vmem:[#allocation9 + $0x18] sm:$0xff] }
  0x3b   :  { %v375_v14 = vld [vmem:[#allocation9 + $0x20] sm:$0xff]  ;;  %1973 = vmatprep.mubr.msk.f32.mxu1 %vm104_vm0, %v67_v12  ;;  %2268 = vmatpush1.bf16.msra.mxu0 %v2267_v8  ;;  %v378_v19 = vld [vmem:[#allocation9 + $0x38] sm:$0xff]  ;;  %v381_v20 = vld [vmem:[#allocation9 + $0x50] sm:$0xff] }
  0x3c   :  { %2270 = vmatprep.subr.bf16.mxu0 %v2269_v9  ;;  %v3047_v16 = vpack.c.bf16 %v375_v14, %v372_v13  ;;  %v371_v17 = vld [vmem:[#allocation9] sm:$0xff]  ;;  %v3052_v22 = vpack.c.bf16 %v381_v20, %v378_v19  ;;  %v377_v23 = vld [vmem:[#allocation9 + $0x30] sm:$0xff]  ;;  %v380_v24 = vld [vmem:[#allocation9 + $0x48] sm:$0xff] }
  0x3d   :  { %v3049_v21 = vpack.c.bf16 %v374_v18, %v371_v17  ;;  %v384_v25 = vld [vmem:[#allocation9 + $0x68] sm:$0xff]  ;;  %v387_v26 = vld [vmem:[#allocation9 + $0x80] sm:$0xff]  ;;  %v77_v27 = vld [vmem:[#allocation7 + $0x10] sm:$0xff]  ;;  %v3057_v30 = vpack.c.bf16 %v380_v24, %v377_v23 }
  0x3e   :  { %v80_v28 = vld [vmem:[#allocation7 + $0x28] sm:$0xff]  ;;  %v383_v31 = vld [vmem:[#allocation9 + $0x60] sm:$0xff]  ;;  %v3060_v33 = vpack.c.bf16 %v387_v26, %v384_v25  ;;  %v386_v34 = vld [vmem:[#allocation9 + $0x78] sm:$0xff] }
  0x3f   :  { %2272 = vmatpush1.bf16.msra.mxu0 %v2271_v15  ;;  %v68_v29 = vld [vmem:[#allocation4 + $0x8] sm:$0xff]  ;;  %v2273_v32 = vpack.c.bf16 %v80_v28, %v77_v27  ;;  %v83_v35 = vld [vmem:[#allocation7 + $0x40] sm:$0xff]  ;;  %v86_v36 = vld [vmem:[#allocation7 + $0x58] sm:$0xff]  ;;  %v3065_v41 = vpack.c.bf16 %v386_v34, %v383_v31 }
  0x40   :  { %2282 = vmatprep.subr.bf16.mxu0 %v3047_v16  ;;  %v390_v37 = vld [vmem:[#allocation9 + $0x98] sm:$0xff]  ;;  %v393_v38 = vld [vmem:[#allocation9 + $0xb0] sm:$0xff]  ;;  %v2277_v39 = vpack.c.bf16 %v86_v36, %v83_v35  ;;  %v376_v43 = vld [vmem:[#allocation9 + $0x28] sm:$0xff] }
  0x41   :  { %2274 = vmatprep.subr.bf16.mxu1 %v2273_v32  ;;  %v69_v40 = vld [vmem:[#allocation4 + $0x10] sm:$0xff]  ;;  %v3068_v44 = vpack.c.bf16 %v393_v38, %v390_v37  ;;  %v392_v46 = vld [vmem:[#allocation9 + $0xa8] sm:$0xff]  ;;  %v399_v48 = vld [vmem:[#allocation9 + $0xe0] sm:$0xff] }
  0x42   :  { %1785 = vmatmul.mubr.msk.f32.vlgmr.msra.gmra.mrb[0].mxu0 %vm104_vm0, %v67_v12  ;;  %2276 = vmatpush3.bf16.msra.mxu1 %v2273_v32  ;;  %v373_v42 = vld [vmem:[#allocation9 + $0x10] sm:$0xff]  ;;  %v396_v47 = vld [vmem:[#allocation9 + $0xc8] sm:$0xff]  ;;  %v70_v50 = vld [vmem:[#allocation4 + $0x18] sm:$0xff] }
  0x43   :  { %2284 = vmatpush1.bf16.msra.mxu0 %v3049_v21  ;;  %199 = vmatprep.mubr.f32.mxu0 %v2969_v0  ;;  %v389_v45 = vld [vmem:[#allocation9 + $0x90] sm:$0xff]  ;;  %v3071_v49 = vpack.c.bf16 %v376_v43, %v373_v42  ;;  %v379_v52 = vld [vmem:[#allocation9 + $0x40] sm:$0xff]  ;;  %v382_v53 = vld [vmem:[#allocation9 + $0x58] sm:$0xff]  ;;  %v3078_v54 = vpack.c.bf16 %v399_v48, %v396_v47  ;;  %v89_v43 = vlaneseq }
  0x44   :  { %2286 = vmatprep.subr.bf16.mxu0 %v3052_v22  ;;  %2278 = vmatprep.subr.bf16.mxu1 %v2277_v39  ;;  %v3075_v51 = vpack.c.bf16 %v392_v46, %v389_v45  ;;  %v395_v55 = vld [vmem:[#allocation9 + $0xc0] sm:$0xff]  ;;  %v398_v56 = vld [vmem:[#allocation9 + $0xd8] sm:$0xff]  ;;  %v405_v59 = vld [vmem:[#allocation9 + $0x110] sm:$0xff]  ;;  %v3084_v60 = vpack.c.bf16 %v382_v53, %v379_v52 }
  0x45   :  { %v402_v58 = vld [vmem:[#allocation9 + $0xf8] sm:$0xff]  ;;  %v71_v61 = vld [vmem:[#allocation4 + $0x20] sm:$0xff]  ;;  %v3088_v62 = vpack.c.bf16 %v398_v56, %v395_v55  ;;  %v385_v63 = vld [vmem:[#allocation9 + $0x70] sm:$0xff]  ;;  %v90_v45 = vshrl.u32 %v89_v43, 7 }
  0x46   :  { %1786 = vmatmul.mubr.msk.f32.gmra.mrb[2].mxu0 %vm104_vm0, %v68_v29  ;;  %2280 = vmatpush3.bf16.msra.mxu1 %v2277_v39  ;;  %v388_v1 = vld [vmem:[#allocation9 + $0x88] sm:$0xff]  ;;  %v3091_v2 = vpack.c.bf16 %v405_v59, %v402_v58  ;;  %v401_v3 = vld [vmem:[#allocation9 + $0xf0] sm:$0xff]  ;;  %v411_v6 = vld [vmem:[#allocation9 + $0x140] sm:$0xff] }
  0x47   :  { %2288 = vmatpush1.bf16.msra.mxu0 %v3057_v30  ;;  %205 = vmatprep.mubr.f32.mxu0 %v2969_v0  ;;  %v404_v4 = vld [vmem:[#allocation9 + $0x108] sm:$0xff]  ;;  %v3097_v7 = vpack.c.bf16 %v388_v1, %v385_v63  ;;  %v391_v10 = vld [vmem:[#allocation9 + $0xa0] sm:$0xff]  ;;  %v394_v11 = vld [vmem:[#allocation9 + $0xb8] sm:$0xff]  ;;  %v99_v46 = vsub.s32 2, %v90_v45  ;;  %v91_v59 = vsub.s32 0, %v90_v45  ;;  %v95_v1 = vsub.s32 1, %v90_v45 }
  0x48   :  { %2290 = vmatprep.subr.bf16.mxu0 %v3060_v33  ;;  %2313 = vmatprep.subr.bf16.mxu1 %v2970_v57  ;;  %v408_v5 = vld [vmem:[#allocation9 + $0x128] sm:$0xff]  ;;  %v3101_v9 = vpack.c.bf16 %v404_v4, %v401_v3  ;;  %v407_v13 = vld [vmem:[#allocation9 + $0x120] sm:$0xff]  ;;  %v410_v14 = vld [vmem:[#allocation9 + $0x138] sm:$0xff]  ;;  %v3110_v18 = vpack.c.bf16 %v394_v11, %v391_v10 }
  0x49   :  { %1974 = vmatmul.mubr.msk.f32.vlgmr.msra.gmra.mrb[0].mxu1 %vm104_vm0, %v68_v29  ;;  %v72_v8 = vld [vmem:[#allocation4 + $0x28] sm:$0xff]  ;;  %v3104_v12 = vpack.c.bf16 %v411_v6, %v408_v5  ;;  %v414_v15 = vld [vmem:[#allocation9 + $0x158] sm:$0xff]  ;;  %v417_v17 = vld [vmem:[#allocation9 + $0x170] sm:$0xff]  ;;  %v3114_v20 = vpack.c.bf16 %v410_v14, %v407_v13 }
  0x4a   :  { %1787 = vmatmul.mubr.msk.f32.gmra.mrb[4].mxu0 %vm104_vm0, %v69_v40  ;;  %2315 = vmatpush3.bf16.msra.mxu1 %v3071_v49  ;;  %v73_v19 = vld [vmem:[#allocation4 + $0x30] sm:$0xff]  ;;  %v400_v24 = vld [vmem:[#allocation9 + $0xe8] sm:$0xff]  ;;  %v3117_v25 = vpack.c.bf16 %v417_v17, %v414_v15  ;;  %v74_v29 = vld [vmem:[#allocation4 + $0x38] sm:$0xff] }
  0x4b   :  { %2292 = vmatpush1.bf16.msra.mxu0 %v3065_v41  ;;  %211 = vmatprep.mubr.f32.mxu0 %v2969_v0  ;;  %v397_v23 = vld [vmem:[#allocation9 + $0xd0] sm:$0xff]  ;;  %v416_v27 = vld [vmem:[#allocation9 + $0x168] sm:$0xff]  ;;  %v403_v32 = vld [vmem:[#allocation9 + $0x100] sm:$0xff] }
  0x4c   :  { %2294 = vmatprep.subr.bf16.mxu0 %v3068_v44  ;;  %2316 = vmatprep.subr.bf16.mxu1 %v2970_v57  ;;  %v413_v26 = vld [vmem:[#allocation9 + $0x150] sm:$0xff]  ;;  %v3123_v28 = vpack.c.bf16 %v400_v24, %v397_v23  ;;  %v406_v34 = vld [vmem:[#allocation9 + $0x118] sm:$0xff]  ;;  %v412_v37 = vld [vmem:[#allocation9 + $0x148] sm:$0xff] }
  0x4d   :  { %1976 = vmatprep.mubr.msk.f32.mxu1 %vm104_vm0, %v69_v40  ;;  %v3127_v31 = vpack.c.bf16 %v416_v27, %v413_v26  ;;  %v3134_v35 = vpack.c.bf16 %v406_v34, %v403_v32  ;;  %v409_v36 = vld [vmem:[#allocation9 + $0x130] sm:$0xff]  ;;  %v415_v39 = vld [vmem:[#allocation9 + $0x160] sm:$0xff]  ;;  %v418_v40 = vld [vmem:[#allocation9 + $0x178] sm:$0xff] }
  0x4e   :  { %1788 = vmatmul.mubr.msk.f32.gmra.mrb[6].mxu0 %vm104_vm0, %v70_v50  ;;  %2318 = vmatpush3.bf16.msra.mxu1 %v3084_v60  ;;  %v3144_v38 = vpack.c.bf16 %v412_v37, %v409_v36  ;;  %v3153_v42 = vpack.c.bf16 %v418_v40, %v415_v39  ;;  %v87_v47 = vld [vmem:[%s3471_s3] sm:$0x7]  ;;  %s2972_s3 = smov [#allocation10]  }
  0x4f   :  { %2296 = vmatpush1.bf16.msra.mxu0 %v3075_v51  ;;  %217 = vmatprep.mubr.f32.mxu0 %v2969_v0  ;;  %v100_v48 = vrot.slane %v87_v47, %v99_v46  ;;  %v419_v63 = vld [vmem:[%s3472_s4] sm:$0x7]  ;;  %v92_v3 = vrot.slane %v87_v47, %v91_v59  ;;  %v96_v6 = vrot.slane %v87_v47, %v95_v1  ;;  %s1775_s4 = sshll.u32 %s2972_s3, 4  ;;  %s1776_s4 = int_to_ptr.vmem [resolvable:$true] %s1775_s4 }
  0x50   :  { %2298 = vmatprep.subr.bf16.mxu0 %v3078_v54  ;;  %2319 = vmatprep.subr.bf16.mxu1 %v2970_v57  ;;  %v424_v4 = vrot.slane %v419_v63, %v91_v59  ;;  %v3217_v45 = vrot.slane %v419_v63, %v99_v46  ;;  %s2934_s9 = scalar_lea.vmem %s1776_s4, 128  ;;  %p2939_p11 = scmp.lt.s32.totalorder %s1776_s4, %s1776_s4 }
  0x51   :  { %1977 = vmatmul.mubr.msk.f32.gmra.mrb[2].mxu1 %vm104_vm0, %v70_v50  ;;  %p2935_p10 = scmp.ne.s32.totalorder %s1776_s4, %s2934_s9  ;;  %p2940_p12 = scmp.lt.s32.totalorder %s2934_s9, %s2934_s9 }
  0x52   :  { %1789 = vmatmul.mubr.msk.f32.gmra.mrb[8].mxu0 %vm104_vm0, %v71_v61  ;;  %2321 = vmatpush3.bf16.msra.mxu1 %v3097_v7  ;;  %v3205_v13 = vadd.f32 %v424_v4, %v92_v3 }
  0x53   :  { %2300 = vmatpush1.bf16.msra.mxu0 %v3088_v62  ;;  %223 = vmatprep.mubr.f32.mxu0 %v2969_v0  ;;  %p2941_p13 = por %p2940_p12, %p2939_p11 }
  0x54   :  { %2302 = vmatprep.subr.bf16.mxu0 %v3091_v2  ;;  %2322 = vmatprep.subr.bf16.mxu1 %v2970_v57 }
  0x55   :  { %1979 = vmatprep.mubr.msk.f32.mxu1 %vm104_vm0, %v71_v61  ;;  %p2942_p0 = pnand %p2941_p13, %p2935_p10 }
  0x56   :  { %1790 = vmatmul.mubr.msk.f32.gmra.mrb[10].mxu0 %vm104_vm0, %v72_v8  ;;  %2324 = vmatpush3.bf16.msra.mxu1 %v3110_v18 }
  0x57   :  { %2304 = vmatpush1.bf16.msra.mxu0 %v3101_v9  ;;  %229 = vmatprep.mubr.f32.mxu0 %v2969_v0 }
  0x58   :  { %2306 = vmatprep.subr.bf16.mxu0 %v3104_v12  ;;  %2325 = vmatprep.subr.bf16.mxu1 %v2970_v57 }
  0x59   :  { %1980 = vmatmul.mubr.msk.f32.gmra.mrb[4].mxu1 %vm104_vm0, %v72_v8  ;;  %v428_v8 = vrot.slane %v419_v63, %v95_v1 }
  0x5a   :  { %1791 = vmatmul.mubr.msk.f32.gmra.mrb[12].mxu0 %vm104_vm0, %v73_v19  ;;  %2327 = vmatpush3.bf16.msra.mxu1 %v3123_v28 }
  0x5b   :  { %2308 = vmatpush1.bf16.msra.mxu0 %v3114_v20  ;;  %235 = vmatprep.mubr.f32.mxu0 %v2969_v0 }
  0x5c   :  { %2310 = vmatprep.subr.bf16.mxu0 %v3117_v25  ;;  %2328 = vmatprep.subr.bf16.mxu1 %v2970_v57 }
  0x5d   :  { %1982 = vmatprep.mubr.msk.f32.mxu1 %vm104_vm0, %v73_v19  ;;  %v3209_v19 = vadd.f32 %v428_v8, %v96_v6 }
  0x5e   :  { %1792 = vmatmul.mubr.msk.f32.gmra.mrb[14].mxu0 %vm104_vm0, %v74_v29  ;;  %1983 = vmatmul.mubr.msk.f32.gmra.mrb[6].mxu1 %vm104_vm0, %v74_v29 }
  0x5f   :  { %2312 = vmatpush1.bf16.msra.mxu0 %v3127_v31  ;;  %504 = vmatprep.mubr.f32.mxu0 %v2969_v0 }
  0x60   :  { %2338 = vmatprep.subr.bf16.mxu0 %v3047_v16  ;;  %2330 = vmatpush3.bf16.msra.mxu1 %v3134_v35 }
  0x61   :  { %2331 = vmatprep.subr.bf16.mxu1 %v2970_v57  ;;  %2017 = vmatprep.mubr.msk.f32.mxu1 %vm2971_vm1, %v2969_v0 }
  0x62   :  { %505 = vmatmul.mubr.f32.vlgmr.msra.gmra.mrb[0].mxu0 %v2969_v0 }
  0x63   :  { %2340 = vmatpush1.bf16.msra.mxu0 %v3049_v21  ;;  %670 = vmatprep.mubr.f32.mxu0 %v2969_v0 }
  0x64   :  { %2342 = vmatprep.subr.bf16.mxu0 %v3052_v22  ;;  %2333 = vmatpush3.bf16.msra.mxu1 %v3144_v38 }
  0x65   :  { %2334 = vmatprep.subr.bf16.mxu1 %v2970_v57 }
  0x67   :  { %2344 = vmatpush1.bf16.msra.mxu0 %v3057_v30 }
  0x68   :  { %2346 = vmatprep.subr.bf16.mxu0 %v3060_v33  ;;  %2336 = vmatpush3.bf16.msra.mxu1 %v3153_v42 }
  0x69   :  { %2369 = vmatprep.subr.bf16.mxu1 %v2970_v57 }
  0x6b   :  { %2348 = vmatpush1.bf16.msra.mxu0 %v3065_v41  ;;  %2018 = vmatmul.mubr.f32.vlgmr.msra.gmra.mrb[8].mxu1 %v2969_v0 }
  0x6c   :  { %2350 = vmatprep.subr.bf16.mxu0 %v3068_v44  ;;  %2371 = vmatpush3.bf16.msra.mxu1 %v3071_v49 }
  0x6d   :  { %2052 = vmatprep.mubr.msk.f32.mxu1 %vm2971_vm1, %v2969_v0  ;;  %2372 = vmatprep.subr.bf16.mxu1 %v2970_v57 }
  0x6f   :  { %2352 = vmatpush1.bf16.msra.mxu0 %v3075_v51 }
  0x70   :  { %2354 = vmatprep.subr.bf16.mxu0 %v3078_v54  ;;  %2374 = vmatpush3.bf16.msra.mxu1 %v3084_v60 }
  0x71   :  { %2375 = vmatprep.subr.bf16.mxu1 %v2970_v57 }
  0x73   :  { %2356 = vmatpush1.bf16.msra.mxu0 %v3088_v62 }
  0x74   :  { %2358 = vmatprep.subr.bf16.mxu0 %v3091_v2  ;;  %2377 = vmatpush3.bf16.msra.mxu1 %v3097_v7 }
  0x75   :  { %2378 = vmatprep.subr.bf16.mxu1 %v2970_v57 }
  0x77   :  { %2360 = vmatpush1.bf16.msra.mxu0 %v3101_v9 }
  0x78   :  { %2362 = vmatprep.subr.bf16.mxu0 %v3104_v12  ;;  %2380 = vmatpush3.bf16.msra.mxu1 %v3110_v18 }
  0x79   :  { %2381 = vmatprep.subr.bf16.mxu1 %v2970_v57 }
  0x7b   :  { %2364 = vmatpush1.bf16.msra.mxu0 %v3114_v20 }
  0x7c   :  { %2366 = vmatprep.subr.bf16.mxu0 %v3117_v25  ;;  %2383 = vmatpush3.bf16.msra.mxu1 %v3123_v28 }
  0x7d   :  { %2384 = vmatprep.subr.bf16.mxu1 %v2970_v57 }
  0x7f   :  { %2368 = vmatpush1.bf16.msra.mxu0 %v3127_v31 }
  0x80   :  { %2394 = vmatprep.subr.bf16.mxu0 %v3047_v16  ;;  %2386 = vmatpush3.bf16.msra.mxu1 %v3134_v35 }
  0x81   :  { %2387 = vmatprep.subr.bf16.mxu1 %v2970_v57 }
  0x84   :  { %2389 = vmatpush3.bf16.msra.mxu1 %v3144_v38 }
  0x85   :  { %2390 = vmatprep.subr.bf16.mxu1 %v2970_v57 }
  0x88   :  { %2392 = vmatpush3.bf16.msra.mxu1 %v3153_v42 }
  0x89   :  { %2425 = vmatprep.subr.bf16.mxu1 %v2970_v57 }
 0x11c   :  { %v1975_v50 = vpop.f32.mrb[0].mxu1 }
 0x11d   :  { %v3194_v52 = vadd.f32 %v1975_v50, %v100_v48  ;;  %v308_v53 = vpop.f32.mrb[1].mxu1 }
 0x11e   :  { %v309_v59 = vadd.f32 %v308_v53, %v100_v48 }
 0x124   :  { %v1978_v55 = vpop.f32.mrb[2].mxu1 }
 0x125   :  { %v3196_v56 = vadd.f32 %v1978_v55, %v100_v48  ;;  %v318_v58 = vpop.f32.mrb[3].mxu1 }
 0x126   :  { %v3198_v61 = vadd.f32 %v318_v58, %v100_v48 }
 0x12c   :  { %v1981_v5 = vpop.f32.mrb[4].mxu1 }
 0x12d   :  { %v3203_v10 = vadd.f32 %v1981_v5, %v100_v48  ;;  %v328_v11 = vpop.f32.mrb[5].mxu1 }
 0x12e   :  { %v3207_v14 = vadd.f32 %v328_v11, %v100_v48 }
 0x131   :  { %v1984_v15 = vpop.f32.mrb[6].mxu1 }
 0x132   :  { %v3211_v23 = vadd.f32 %v1984_v15, %v100_v48  ;;  %v338_v24 = vpop.f32.mrb[7].mxu1 }
 0x133   :  { %v3214_v29 = vadd.f32 %v338_v24, %v100_v48 }
 0x135   :  { %v506_v17 = vpop.f32.mrb[0].mxu0 }
 0x136   :  { %v2730_v26 = vadd.f32 %v3205_v13, %v506_v17  ;;  %v508_v27 = vpop.f32.mrb[1].mxu0 }
 0x137   :  { %v2732_v34 = vadd.f32 %v3209_v19, %v508_v27 }
 0x138   :  { %v1801_v32 = vmul.f32 -1.442695, %v2730_v26 }
 0x139   :  { %v1802_v36 = vmul.f32 -1.442695, %v2732_v34 }
 0x13a   :  { %2788 = vpow2.f32 %v1801_v32 }
 0x13b   :  { %2790 = vpow2.f32 %v1802_v36 }
 0x13e   :  { %v577_v37 = vpop.f32.mrb[8].mxu1 }
 0x13f   :  { %v2019_v39 = vpop.f32.mrb[9].mxu1  ;;  %v578_v55 = vadd.f32 %v577_v37, %v3217_v45 }
 0x144   :  { %v2789_v40 = vpop.eup %2788 }
 0x145   :  { %v585_v43 = vadd.f32 1.0, %v2789_v40  ;;  %v2791_v47 = vpop.eup %2790 }
 0x146   :  { %v592_v50 = vadd.f32 1.0, %v2791_v47 }
 0x147   :  { %2792 = vrcp.f32 %v585_v43 }
 0x148   :  { %2794 = vrcp.f32 %v592_v50 }
 0x151   :  { %v2793_v58 = vpop.eup %2792 }
 0x152   :  { %v595_v1 = vmul.f32 %v2793_v58, %v578_v55  ;;  %v2795_v4 = vpop.eup %2794 }
 0x153   :  { %v598_v5 = vsub.f32 1.0, %v2795_v4  ;;  %v600_v11 = vmul.f32 0.0, %v2795_v4 }
 0x154   :  { %v596_v3 = vadd.f32 %v595_v1, %v309_v59 }
 0x156   :  { %2796 = vtanh.f32 %v596_v3 }
 0x160   :  { %v2797_v6 = vpop.eup %2796 }
 0x161   :  { %v599_v8 = vmul.f32 %v2797_v6, %v598_v5 }
 0x163   :  { %v601_v15 = vadd.f32 %v600_v11, %v599_v8 }
 0x165   :  { %671 = vmatmul.mubr.f32.vlgmr.msra.gmra.mrb[2].mxu0 %v601_v15  ;;  %2053 = vmatmul.mubr.f32.vlgmr.msra.gmra.mrb[10].mxu1 %v601_v15 }
 0x166   :  { %2396 = vmatpush1.bf16.msra.mxu0 %v3049_v21  ;;  %2427 = vmatpush3.bf16.msra.mxu1 %v3071_v49 }
 0x167   :  { %2398 = vmatprep.subr.bf16.mxu0 %v3052_v22  ;;  %2428 = vmatprep.subr.bf16.mxu1 %v2970_v57 }
 0x168   :  { %836 = vmatprep.mubr.f32.mxu0 %v2969_v0  ;;  %2087 = vmatprep.mubr.msk.f32.mxu1 %vm2971_vm1, %v2969_v0 }
 0x16a   :  { %2400 = vmatpush1.bf16.msra.mxu0 %v3057_v30  ;;  %2430 = vmatpush3.bf16.msra.mxu1 %v3084_v60 }
 0x16b   :  { %2402 = vmatprep.subr.bf16.mxu0 %v3060_v33  ;;  %2431 = vmatprep.subr.bf16.mxu1 %v2970_v57 }
 0x16e   :  { %2404 = vmatpush1.bf16.msra.mxu0 %v3065_v41  ;;  %2433 = vmatpush3.bf16.msra.mxu1 %v3097_v7 }
 0x16f   :  { %2406 = vmatprep.subr.bf16.mxu0 %v3068_v44  ;;  %2434 = vmatprep.subr.bf16.mxu1 %v2970_v57 }
 0x172   :  { %2408 = vmatpush1.bf16.msra.mxu0 %v3075_v51  ;;  %2436 = vmatpush3.bf16.msra.mxu1 %v3110_v18 }
 0x173   :  { %2410 = vmatprep.subr.bf16.mxu0 %v3078_v54  ;;  %2437 = vmatprep.subr.bf16.mxu1 %v2970_v57 }
 0x176   :  { %2412 = vmatpush1.bf16.msra.mxu0 %v3088_v62  ;;  %2439 = vmatpush3.bf16.msra.mxu1 %v3123_v28 }
 0x177   :  { %2414 = vmatprep.subr.bf16.mxu0 %v3091_v2  ;;  %2440 = vmatprep.subr.bf16.mxu1 %v2970_v57 }
 0x17a   :  { %2416 = vmatpush1.bf16.msra.mxu0 %v3101_v9  ;;  %2442 = vmatpush3.bf16.msra.mxu1 %v3134_v35 }
 0x17b   :  { %2418 = vmatprep.subr.bf16.mxu0 %v3104_v12  ;;  %2443 = vmatprep.subr.bf16.mxu1 %v2970_v57 }
 0x17e   :  { %2420 = vmatpush1.bf16.msra.mxu0 %v3114_v20  ;;  %2445 = vmatpush3.bf16.msra.mxu1 %v3144_v38 }
 0x17f   :  { %2422 = vmatprep.subr.bf16.mxu0 %v3117_v25  ;;  %2446 = vmatprep.subr.bf16.mxu1 %v2970_v57 }
 0x182   :  { %2424 = vmatpush1.bf16.msra.mxu0 %v3127_v31  ;;  %2448 = vmatpush3.bf16.msra.mxu1 %v3153_v42 }
 0x183   :  { %2450 = vmatprep.subr.bf16.mxu0 %v3047_v16  ;;  %2481 = vmatprep.subr.bf16.mxu1 %v2970_v57 }
 0x238   :  { %v672_v46 = vpop.f32.mrb[2].mxu0  ;;  %v743_v48 = vpop.f32.mrb[10].mxu1 }
 0x239   :  { %v2734_v53 = vadd.f32 %v3205_v13, %v672_v46  ;;  %v674_v63 = vpop.f32.mrb[3].mxu0  ;;  %v2054_v17 = vpop.f32.mrb[11].mxu1  ;;  %v744_v39 = vadd.f32 %v743_v48, %v3217_v45 }
 0x23a   :  { %v2736_v26 = vadd.f32 %v3209_v19, %v674_v63 }
 0x23b   :  { %v1803_v24 = vmul.f32 -1.442695, %v2734_v53 }
 0x23c   :  { %v1804_v27 = vmul.f32 -1.442695, %v2736_v26 }
 0x23d   :  { %2798 = vpow2.f32 %v1803_v24 }
 0x23e   :  { %2800 = vpow2.f32 %v1804_v27 }
 0x247   :  { %v2799_v32 = vpop.eup %2798 }
 0x248   :  { %v751_v34 = vadd.f32 1.0, %v2799_v32  ;;  %v2801_v36 = vpop.eup %2800 }
 0x249   :  { %v758_v37 = vadd.f32 1.0, %v2801_v36 }
 0x24a   :  { %2802 = vrcp.f32 %v751_v34 }
 0x24b   :  { %2804 = vrcp.f32 %v758_v37 }
 0x254   :  { %v2803_v40 = vpop.eup %2802 }
 0x255   :  { %v761_v43 = vmul.f32 %v2803_v40, %v744_v39  ;;  %v2805_v50 = vpop.eup %2804 }
 0x256   :  { %v764_v55 = vsub.f32 1.0, %v2805_v50  ;;  %v766_v1 = vmul.f32 %v2805_v50, %v601_v15 }
 0x257   :  { %v762_v47 = vadd.f32 %v761_v43, %v3194_v52 }
 0x259   :  { %2806 = vtanh.f32 %v762_v47 }
 0x263   :  { %v2807_v58 = vpop.eup %2806 }
 0x264   :  { %v765_v59 = vmul.f32 %v2807_v58, %v764_v55 }
 0x266   :  { %v767_v3 = vadd.f32 %v766_v1, %v765_v59 }
 0x268   :  { %837 = vmatmul.mubr.f32.vlgmr.msra.gmra.mrb[4].mxu0 %v767_v3  ;;  %2088 = vmatmul.mubr.f32.vlgmr.msra.gmra.mrb[12].mxu1 %v767_v3 }
 0x269   :  { %2452 = vmatpush1.bf16.msra.mxu0 %v3049_v21  ;;  %2483 = vmatpush3.bf16.msra.mxu1 %v3071_v49 }
 0x26a   :  { %2454 = vmatprep.subr.bf16.mxu0 %v3052_v22  ;;  %2484 = vmatprep.subr.bf16.mxu1 %v2970_v57 }
 0x26b   :  { %1002 = vmatprep.mubr.f32.mxu0 %v2969_v0  ;;  %2122 = vmatprep.mubr.msk.f32.mxu1 %vm2971_vm1, %v2969_v0 }
 0x26d   :  { %2456 = vmatpush1.bf16.msra.mxu0 %v3057_v30  ;;  %2486 = vmatpush3.bf16.msra.mxu1 %v3084_v60 }
 0x26e   :  { %2458 = vmatprep.subr.bf16.mxu0 %v3060_v33  ;;  %2487 = vmatprep.subr.bf16.mxu1 %v2970_v57 }
 0x271   :  { %2460 = vmatpush1.bf16.msra.mxu0 %v3065_v41  ;;  %2489 = vmatpush3.bf16.msra.mxu1 %v3097_v7 }
 0x272   :  { %2462 = vmatprep.subr.bf16.mxu0 %v3068_v44  ;;  %2490 = vmatprep.subr.bf16.mxu1 %v2970_v57 }
 0x275   :  { %2464 = vmatpush1.bf16.msra.mxu0 %v3075_v51  ;;  %2492 = vmatpush3.bf16.msra.mxu1 %v3110_v18 }
 0x276   :  { %2466 = vmatprep.subr.bf16.mxu0 %v3078_v54  ;;  %2493 = vmatprep.subr.bf16.mxu1 %v2970_v57 }
 0x279   :  { %2468 = vmatpush1.bf16.msra.mxu0 %v3088_v62  ;;  %2495 = vmatpush3.bf16.msra.mxu1 %v3123_v28 }
 0x27a   :  { %2470 = vmatprep.subr.bf16.mxu0 %v3091_v2  ;;  %2496 = vmatprep.subr.bf16.mxu1 %v2970_v57 }
 0x27d   :  { %2472 = vmatpush1.bf16.msra.mxu0 %v3101_v9  ;;  %2498 = vmatpush3.bf16.msra.mxu1 %v3134_v35 }
 0x27e   :  { %2474 = vmatprep.subr.bf16.mxu0 %v3104_v12  ;;  %2499 = vmatprep.subr.bf16.mxu1 %v2970_v57 }
 0x281   :  { %2476 = vmatpush1.bf16.msra.mxu0 %v3114_v20  ;;  %2501 = vmatpush3.bf16.msra.mxu1 %v3144_v38 }
 0x282   :  { %2478 = vmatprep.subr.bf16.mxu0 %v3117_v25  ;;  %2502 = vmatprep.subr.bf16.mxu1 %v2970_v57 }
 0x285   :  { %2480 = vmatpush1.bf16.msra.mxu0 %v3127_v31  ;;  %2504 = vmatpush3.bf16.msra.mxu1 %v3153_v42 }
 0x286   :  { %2506 = vmatprep.subr.bf16.mxu0 %v3047_v16  ;;  %2537 = vmatprep.subr.bf16.mxu1 %v2970_v57 }
 0x33b   :  { %v838_v52 = vpop.f32.mrb[4].mxu0  ;;  %v909_v4 = vpop.f32.mrb[12].mxu1 }
 0x33c   :  { %v2738_v5 = vadd.f32 %v3205_v13, %v838_v52  ;;  %v840_v6 = vpop.f32.mrb[5].mxu0  ;;  %v2089_v8 = vpop.f32.mrb[13].mxu1  ;;  %v910_v24 = vadd.f32 %v909_v4, %v3217_v45 }
 0x33d   :  { %v2740_v15 = vadd.f32 %v3209_v19, %v840_v6 }
 0x33e   :  { %v1805_v11 = vmul.f32 -1.442695, %v2738_v5 }
 0x33f   :  { %v1806_v46 = vmul.f32 -1.442695, %v2740_v15 }
 0x340   :  { %2808 = vpow2.f32 %v1805_v11 }
 0x341   :  { %2810 = vpow2.f32 %v1806_v46 }
 0x34a   :  { %v2809_v48 = vpop.eup %2808 }
 0x34b   :  { %v917_v53 = vadd.f32 1.0, %v2809_v48  ;;  %v2811_v63 = vpop.eup %2810 }
 0x34c   :  { %v924_v17 = vadd.f32 1.0, %v2811_v63 }
 0x34d   :  { %2812 = vrcp.f32 %v917_v53 }
 0x34e   :  { %2814 = vrcp.f32 %v924_v17 }
 0x357   :  { %v2813_v26 = vpop.eup %2812 }
 0x358   :  { %v927_v27 = vmul.f32 %v2813_v26, %v910_v24  ;;  %v2815_v34 = vpop.eup %2814 }
 0x359   :  { %v930_v36 = vsub.f32 1.0, %v2815_v34  ;;  %v932_v40 = vmul.f32 %v2815_v34, %v767_v3 }
 0x35a   :  { %v928_v32 = vadd.f32 %v927_v27, %v3198_v61 }
 0x35c   :  { %2816 = vtanh.f32 %v928_v32 }
 0x366   :  { %v2817_v37 = vpop.eup %2816 }
 0x367   :  { %v931_v39 = vmul.f32 %v2817_v37, %v930_v36 }
 0x369   :  { %v933_v43 = vadd.f32 %v932_v40, %v931_v39 }
 0x36b   :  { %1003 = vmatmul.mubr.f32.vlgmr.msra.gmra.mrb[6].mxu0 %v933_v43  ;;  %2123 = vmatmul.mubr.f32.vlgmr.msra.gmra.mrb[14].mxu1 %v933_v43 }
 0x36c   :  { %2508 = vmatpush1.bf16.msra.mxu0 %v3049_v21  ;;  %2539 = vmatpush3.bf16.msra.mxu1 %v3071_v49 }
 0x36d   :  { %2510 = vmatprep.subr.bf16.mxu0 %v3052_v22  ;;  %2540 = vmatprep.subr.bf16.mxu1 %v2970_v57 }
 0x36e   :  { %1168 = vmatprep.mubr.f32.mxu0 %v2969_v0  ;;  %2157 = vmatprep.mubr.msk.f32.mxu1 %vm2971_vm1, %v2969_v0 }
 0x370   :  { %2512 = vmatpush1.bf16.msra.mxu0 %v3057_v30  ;;  %2542 = vmatpush3.bf16.msra.mxu1 %v3084_v60 }
 0x371   :  { %2514 = vmatprep.subr.bf16.mxu0 %v3060_v33  ;;  %2543 = vmatprep.subr.bf16.mxu1 %v2970_v57 }
 0x374   :  { %2516 = vmatpush1.bf16.msra.mxu0 %v3065_v41  ;;  %2545 = vmatpush3.bf16.msra.mxu1 %v3097_v7 }
 0x375   :  { %2518 = vmatprep.subr.bf16.mxu0 %v3068_v44  ;;  %2546 = vmatprep.subr.bf16.mxu1 %v2970_v57 }
 0x378   :  { %2520 = vmatpush1.bf16.msra.mxu0 %v3075_v51  ;;  %2548 = vmatpush3.bf16.msra.mxu1 %v3110_v18 }
 0x379   :  { %2522 = vmatprep.subr.bf16.mxu0 %v3078_v54  ;;  %2549 = vmatprep.subr.bf16.mxu1 %v2970_v57 }
 0x37c   :  { %2524 = vmatpush1.bf16.msra.mxu0 %v3088_v62  ;;  %2551 = vmatpush3.bf16.msra.mxu1 %v3123_v28 }
 0x37d   :  { %2526 = vmatprep.subr.bf16.mxu0 %v3091_v2  ;;  %2552 = vmatprep.subr.bf16.mxu1 %v2970_v57 }
 0x380   :  { %2528 = vmatpush1.bf16.msra.mxu0 %v3101_v9  ;;  %2554 = vmatpush3.bf16.msra.mxu1 %v3134_v35 }
 0x381   :  { %2530 = vmatprep.subr.bf16.mxu0 %v3104_v12  ;;  %2555 = vmatprep.subr.bf16.mxu1 %v2970_v57 }
 0x384   :  { %2532 = vmatpush1.bf16.msra.mxu0 %v3114_v20  ;;  %2557 = vmatpush3.bf16.msra.mxu1 %v3144_v38 }
 0x385   :  { %2534 = vmatprep.subr.bf16.mxu0 %v3117_v25  ;;  %2558 = vmatprep.subr.bf16.mxu1 %v2970_v57 }
 0x388   :  { %2536 = vmatpush1.bf16.msra.mxu0 %v3127_v31  ;;  %2560 = vmatpush3.bf16.msra.mxu1 %v3153_v42 }
 0x389   :  { %2562 = vmatprep.subr.bf16.mxu0 %v3047_v16  ;;  %2593 = vmatprep.subr.bf16.mxu1 %v2970_v57 }
 0x43e   :  { %v1004_v61 = vpop.f32.mrb[6].mxu0  ;;  %v1075_v47 = vpop.f32.mrb[14].mxu1 }
 0x43f   :  { %v2742_v50 = vadd.f32 %v3205_v13, %v1004_v61  ;;  %v1006_v55 = vpop.f32.mrb[7].mxu0  ;;  %v2124_v58 = vpop.f32.mrb[15].mxu1  ;;  %v1076_v8 = vadd.f32 %v1075_v47, %v3217_v45 }
 0x440   :  { %v2744_v1 = vadd.f32 %v3209_v19, %v1006_v55 }
 0x441   :  { %v1807_v59 = vmul.f32 -1.442695, %v2742_v50 }
 0x442   :  { %v1808_v3 = vmul.f32 -1.442695, %v2744_v1 }
 0x443   :  { %2818 = vpow2.f32 %v1807_v59 }
 0x444   :  { %2820 = vpow2.f32 %v1808_v3 }
 0x44d   :  { %v2819_v52 = vpop.eup %2818 }
 0x44e   :  { %v1083_v4 = vadd.f32 1.0, %v2819_v52  ;;  %v2821_v5 = vpop.eup %2820 }
 0x44f   :  { %v1090_v6 = vadd.f32 1.0, %v2821_v5 }
 0x450   :  { %2822 = vrcp.f32 %v1083_v4 }
 0x451   :  { %2824 = vrcp.f32 %v1090_v6 }
 0x45a   :  { %v2823_v11 = vpop.eup %2822 }
 0x45b   :  { %v1093_v15 = vmul.f32 %v2823_v11, %v1076_v8  ;;  %v2825_v48 = vpop.eup %2824 }
 0x45c   :  { %v1096_v53 = vsub.f32 1.0, %v2825_v48  ;;  %v1098_v24 = vmul.f32 %v2825_v48, %v933_v43 }
 0x45d   :  { %v1094_v46 = vadd.f32 %v1093_v15, %v3196_v56 }
 0x45f   :  { %2826 = vtanh.f32 %v1094_v46 }
 0x469   :  { %v2827_v63 = vpop.eup %2826 }
 0x46a   :  { %v1097_v17 = vmul.f32 %v2827_v63, %v1096_v53 }
 0x46c   :  { %v1099_v26 = vadd.f32 %v1098_v24, %v1097_v17 }
 0x46e   :  { %1169 = vmatmul.mubr.f32.vlgmr.msra.gmra.mrb[8].mxu0 %v1099_v26  ;;  %2158 = vmatmul.mubr.f32.vlgmr.msra.gmra.mrb[16].mxu1 %v1099_v26 }
 0x46f   :  { %2564 = vmatpush1.bf16.msra.mxu0 %v3049_v21  ;;  %2595 = vmatpush3.bf16.msra.mxu1 %v3071_v49 }
 0x470   :  { %2566 = vmatprep.subr.bf16.mxu0 %v3052_v22  ;;  %2596 = vmatprep.subr.bf16.mxu1 %v2970_v57 }
 0x471   :  { %1334 = vmatprep.mubr.f32.mxu0 %v2969_v0  ;;  %2192 = vmatprep.mubr.msk.f32.mxu1 %vm2971_vm1, %v2969_v0 }
 0x473   :  { %2568 = vmatpush1.bf16.msra.mxu0 %v3057_v30  ;;  %2598 = vmatpush3.bf16.msra.mxu1 %v3084_v60 }
 0x474   :  { %2570 = vmatprep.subr.bf16.mxu0 %v3060_v33  ;;  %2599 = vmatprep.subr.bf16.mxu1 %v2970_v57 }
 0x477   :  { %2572 = vmatpush1.bf16.msra.mxu0 %v3065_v41  ;;  %2601 = vmatpush3.bf16.msra.mxu1 %v3097_v7 }
 0x478   :  { %2574 = vmatprep.subr.bf16.mxu0 %v3068_v44  ;;  %2602 = vmatprep.subr.bf16.mxu1 %v2970_v57 }
 0x47b   :  { %2576 = vmatpush1.bf16.msra.mxu0 %v3075_v51  ;;  %2604 = vmatpush3.bf16.msra.mxu1 %v3110_v18 }
 0x47c   :  { %2578 = vmatprep.subr.bf16.mxu0 %v3078_v54  ;;  %2605 = vmatprep.subr.bf16.mxu1 %v2970_v57 }
 0x47f   :  { %2580 = vmatpush1.bf16.msra.mxu0 %v3088_v62  ;;  %2607 = vmatpush3.bf16.msra.mxu1 %v3123_v28 }
 0x480   :  { %2582 = vmatprep.subr.bf16.mxu0 %v3091_v2  ;;  %2608 = vmatprep.subr.bf16.mxu1 %v2970_v57 }
 0x483   :  { %2584 = vmatpush1.bf16.msra.mxu0 %v3101_v9  ;;  %2610 = vmatpush3.bf16.msra.mxu1 %v3134_v35 }
 0x484   :  { %2586 = vmatprep.subr.bf16.mxu0 %v3104_v12  ;;  %2611 = vmatprep.subr.bf16.mxu1 %v2970_v57 }
 0x487   :  { %2588 = vmatpush1.bf16.msra.mxu0 %v3114_v20  ;;  %2613 = vmatpush3.bf16.msra.mxu1 %v3144_v38 }
 0x488   :  { %2590 = vmatprep.subr.bf16.mxu0 %v3117_v25  ;;  %2614 = vmatprep.subr.bf16.mxu1 %v2970_v57 }
 0x48b   :  { %2592 = vmatpush1.bf16.msra.mxu0 %v3127_v31  ;;  %2616 = vmatpush3.bf16.msra.mxu1 %v3153_v42 }
 0x48c   :  { %2618 = vmatprep.subr.bf16.mxu0 %v3047_v16  ;;  %2649 = vmatprep.subr.bf16.mxu1 %v2970_v57 }
 0x541   :  { %v1170_v56 = vpop.f32.mrb[8].mxu0  ;;  %v1241_v27 = vpop.f32.mrb[16].mxu1 }
 0x542   :  { %v2746_v32 = vadd.f32 %v3205_v13, %v1170_v56  ;;  %v1172_v34 = vpop.f32.mrb[9].mxu0  ;;  %v2159_v36 = vpop.f32.mrb[17].mxu1  ;;  %v1242_v55 = vadd.f32 %v1241_v27, %v3217_v45 }
 0x543   :  { %v2748_v39 = vadd.f32 %v3209_v19, %v1172_v34 }
 0x544   :  { %v1809_v37 = vmul.f32 -1.442695, %v2746_v32 }
 0x545   :  { %v1810_v40 = vmul.f32 -1.442695, %v2748_v39 }
 0x546   :  { %2828 = vpow2.f32 %v1809_v37 }
 0x547   :  { %2830 = vpow2.f32 %v1810_v40 }
 0x550   :  { %v2829_v43 = vpop.eup %2828 }
 0x551   :  { %v1249_v61 = vadd.f32 1.0, %v2829_v43  ;;  %v2831_v47 = vpop.eup %2830 }
 0x552   :  { %v1256_v50 = vadd.f32 1.0, %v2831_v47 }
 0x553   :  { %2832 = vrcp.f32 %v1249_v61 }
 0x554   :  { %2834 = vrcp.f32 %v1256_v50 }
 0x55d   :  { %v2833_v58 = vpop.eup %2832 }
 0x55e   :  { %v1259_v59 = vmul.f32 %v2833_v58, %v1242_v55  ;;  %v2835_v3 = vpop.eup %2834 }
 0x55f   :  { %v1262_v52 = vsub.f32 1.0, %v2835_v3  ;;  %v1264_v6 = vmul.f32 %v2835_v3, %v1099_v26 }
 0x560   :  { %v1260_v1 = vadd.f32 %v1259_v59, %v3207_v14 }
 0x562   :  { %2836 = vtanh.f32 %v1260_v1 }
 0x56c   :  { %v2837_v4 = vpop.eup %2836 }
 0x56d   :  { %v1263_v5 = vmul.f32 %v2837_v4, %v1262_v52 }
 0x56f   :  { %v1265_v8 = vadd.f32 %v1264_v6, %v1263_v5 }
 0x571   :  { %1335 = vmatmul.mubr.f32.vlgmr.msra.gmra.mrb[10].mxu0 %v1265_v8  ;;  %2193 = vmatmul.mubr.f32.vlgmr.msra.gmra.mrb[18].mxu1 %v1265_v8 }
 0x572   :  { %2620 = vmatpush1.bf16.msra.mxu0 %v3049_v21  ;;  %2651 = vmatpush3.bf16.msra.mxu1 %v3071_v49 }
 0x573   :  { %2622 = vmatprep.subr.bf16.mxu0 %v3052_v22  ;;  %2652 = vmatprep.subr.bf16.mxu1 %v2970_v57 }
 0x574   :  { %1500 = vmatprep.mubr.f32.mxu0 %v2969_v0  ;;  %2227 = vmatprep.mubr.msk.f32.mxu1 %vm2971_vm1, %v2969_v0 }
 0x576   :  { %2624 = vmatpush1.bf16.msra.mxu0 %v3057_v30  ;;  %2654 = vmatpush3.bf16.msra.mxu1 %v3084_v60 }
 0x577   :  { %2626 = vmatprep.subr.bf16.mxu0 %v3060_v33  ;;  %2655 = vmatprep.subr.bf16.mxu1 %v2970_v57 }
 0x57a   :  { %2628 = vmatpush1.bf16.msra.mxu0 %v3065_v41  ;;  %2657 = vmatpush3.bf16.msra.mxu1 %v3097_v7 }
 0x57b   :  { %2630 = vmatprep.subr.bf16.mxu0 %v3068_v44  ;;  %2658 = vmatprep.subr.bf16.mxu1 %v2970_v57 }
 0x57e   :  { %2632 = vmatpush1.bf16.msra.mxu0 %v3075_v51  ;;  %2660 = vmatpush3.bf16.msra.mxu1 %v3110_v18 }
 0x57f   :  { %2634 = vmatprep.subr.bf16.mxu0 %v3078_v54  ;;  %2661 = vmatprep.subr.bf16.mxu1 %v2970_v57 }
 0x582   :  { %2636 = vmatpush1.bf16.msra.mxu0 %v3088_v62  ;;  %2663 = vmatpush3.bf16.msra.mxu1 %v3123_v28 }
 0x583   :  { %2638 = vmatprep.subr.bf16.mxu0 %v3091_v2  ;;  %2664 = vmatprep.subr.bf16.mxu1 %v2970_v57 }
 0x586   :  { %2640 = vmatpush1.bf16.msra.mxu0 %v3101_v9  ;;  %2666 = vmatpush3.bf16.msra.mxu1 %v3134_v35 }
 0x587   :  { %2642 = vmatprep.subr.bf16.mxu0 %v3104_v12  ;;  %2667 = vmatprep.subr.bf16.mxu1 %v2970_v57 }
 0x58a   :  { %2644 = vmatpush1.bf16.msra.mxu0 %v3114_v20  ;;  %2669 = vmatpush3.bf16.msra.mxu1 %v3144_v38 }
 0x58b   :  { %2646 = vmatprep.subr.bf16.mxu0 %v3117_v25  ;;  %2670 = vmatprep.subr.bf16.mxu1 %v2970_v57 }
 0x58e   :  { %2648 = vmatpush1.bf16.msra.mxu0 %v3127_v31  ;;  %2672 = vmatpush3.bf16.msra.mxu1 %v3153_v42 }
 0x58f   :  { %2674 = vmatprep.subr.bf16.mxu0 %v3047_v16  ;;  %2705 = vmatprep.subr.bf16.mxu1 %v2970_v57 }
 0x644   :  { %v1336_v14 = vpop.f32.mrb[10].mxu0  ;;  %v1407_v11 = vpop.f32.mrb[18].mxu1 }
 0x645   :  { %v2750_v15 = vadd.f32 %v3205_v13, %v1336_v14  ;;  %v1338_v46 = vpop.f32.mrb[11].mxu0  ;;  %v2194_v48 = vpop.f32.mrb[19].mxu1  ;;  %v1408_v16 = vadd.f32 %v1407_v11, %v3217_v45 }
 0x646   :  { %v2752_v63 = vadd.f32 %v3209_v19, %v1338_v46 }
 0x647   :  { %v1811_v53 = vmul.f32 -1.442695, %v2750_v15 }
 0x648   :  { %v1812_v17 = vmul.f32 -1.442695, %v2752_v63 }
 0x649   :  { %2838 = vpow2.f32 %v1811_v53 }
 0x64a   :  { %2840 = vpow2.f32 %v1812_v17 }
 0x653   :  { %v2839_v24 = vpop.eup %2838 }
 0x654   :  { %v1415_v26 = vadd.f32 1.0, %v2839_v24  ;;  %v2841_v56 = vpop.eup %2840 }
 0x655   :  { %v1422_v27 = vadd.f32 1.0, %v2841_v56 }
 0x656   :  { %2842 = vrcp.f32 %v1415_v26 }
 0x657   :  { %2844 = vrcp.f32 %v1422_v27 }
 0x660   :  { %v2843_v32 = vpop.eup %2842 }
 0x661   :  { %v1425_v34 = vmul.f32 %v2843_v32, %v1408_v16  ;;  %v2845_v37 = vpop.eup %2844 }
 0x662   :  { %v1428_v39 = vsub.f32 1.0, %v2845_v37  ;;  %v1430_v61 = vmul.f32 %v2845_v37, %v1265_v8 }
 0x663   :  { %v1426_v36 = vadd.f32 %v1425_v34, %v3203_v10 }
 0x665   :  { %2846 = vtanh.f32 %v1426_v36 }
 0x66f   :  { %v2847_v40 = vpop.eup %2846 }
 0x670   :  { %v1429_v43 = vmul.f32 %v2847_v40, %v1428_v39 }
 0x672   :  { %v1431_v47 = vadd.f32 %v1430_v61, %v1429_v43 }
 0x674   :  { %1501 = vmatmul.mubr.f32.vlgmr.msra.gmra.mrb[12].mxu0 %v1431_v47  ;;  %2228 = vmatmul.mubr.f32.vlgmr.msra.gmra.mrb[20].mxu1 %v1431_v47 }
 0x675   :  { %2676 = vmatpush1.bf16.msra.mxu0 %v3049_v21  ;;  %2707 = vmatpush3.bf16.msra.mxu1 %v3071_v49 }
 0x676   :  { %2678 = vmatprep.subr.bf16.mxu0 %v3052_v22  ;;  %2708 = vmatprep.subr.bf16.mxu1 %v2970_v57 }
 0x677   :  { %1666 = vmatprep.mubr.f32.mxu0 %v2969_v0  ;;  %2262 = vmatprep.mubr.msk.f32.mxu1 %vm2971_vm1, %v2969_v0 }
 0x679   :  { %2680 = vmatpush1.bf16.msra.mxu0 %v3057_v30  ;;  %2710 = vmatpush3.bf16.msra.mxu1 %v3084_v60 }
 0x67a   :  { %2682 = vmatprep.subr.bf16.mxu0 %v3060_v33  ;;  %2711 = vmatprep.subr.bf16.mxu1 %v2970_v57 }
 0x67d   :  { %2684 = vmatpush1.bf16.msra.mxu0 %v3065_v41  ;;  %2713 = vmatpush3.bf16.msra.mxu1 %v3097_v7 }
 0x67e   :  { %2686 = vmatprep.subr.bf16.mxu0 %v3068_v44  ;;  %2714 = vmatprep.subr.bf16.mxu1 %v2970_v57 }
 0x681   :  { %2688 = vmatpush1.bf16.msra.mxu0 %v3075_v51  ;;  %2716 = vmatpush3.bf16.msra.mxu1 %v3110_v18 }
 0x682   :  { %2690 = vmatprep.subr.bf16.mxu0 %v3078_v54  ;;  %2717 = vmatprep.subr.bf16.mxu1 %v2970_v57 }
 0x685   :  { %2692 = vmatpush1.bf16.msra.mxu0 %v3088_v62  ;;  %2719 = vmatpush3.bf16.msra.mxu1 %v3123_v28 }
 0x686   :  { %2694 = vmatprep.subr.bf16.mxu0 %v3091_v2  ;;  %2720 = vmatprep.subr.bf16.mxu1 %v2970_v57 }
 0x689   :  { %2696 = vmatpush1.bf16.msra.mxu0 %v3101_v9  ;;  %2722 = vmatpush3.bf16.msra.mxu1 %v3134_v35 }
 0x68a   :  { %2698 = vmatprep.subr.bf16.mxu0 %v3104_v12  ;;  %2723 = vmatprep.subr.bf16.mxu1 %v2970_v57 }
 0x68d   :  { %2700 = vmatpush1.bf16.msra.mxu0 %v3114_v20  ;;  %2725 = vmatpush3.bf16.msra.mxu1 %v3144_v38 }
 0x68e   :  { %2702 = vmatprep.subr.bf16.mxu0 %v3117_v25  ;;  %2726 = vmatprep.subr.bf16.mxu1 %v2970_v57 }
 0x691   :  { %2704 = vmatpush1.bf16.msra.mxu0 %v3127_v31  ;;  %2728 = vmatpush3.bf16.msra.mxu1 %v3153_v42 }
 0x747   :  { %v1502_v0 = vpop.f32.mrb[12].mxu0  ;;  %v1573_v21 = vpop.f32.mrb[20].mxu1 }
 0x748   :  { %v2754_v22 = vadd.f32 %v3205_v13, %v1502_v0  ;;  %v1504_v30 = vpop.f32.mrb[13].mxu0  ;;  %v2229_v33 = vpop.f32.mrb[21].mxu1  ;;  %v1574_v62 = vadd.f32 %v1573_v21, %v3217_v45 }
 0x749   :  { %v2756_v44 = vadd.f32 %v3209_v19, %v1504_v30 }
 0x74a   :  { %v1813_v41 = vmul.f32 -1.442695, %v2754_v22 }
 0x74b   :  { %v1814_v49 = vmul.f32 -1.442695, %v2756_v44 }
 0x74c   :  { %2848 = vpow2.f32 %v1813_v41 }
 0x74d   :  { %2850 = vpow2.f32 %v1814_v49 }
 0x756   :  { %v2849_v51 = vpop.eup %2848 }
 0x757   :  { %v1581_v54 = vadd.f32 1.0, %v2849_v51  ;;  %v2851_v57 = vpop.eup %2850 }
 0x758   :  { %v1588_v60 = vadd.f32 1.0, %v2851_v57 }
 0x759   :  { %2852 = vrcp.f32 %v1581_v54 }
 0x75a   :  { %2854 = vrcp.f32 %v1588_v60 }
 0x763   :  { %v2853_v2 = vpop.eup %2852 }
 0x764   :  { %v1591_v7 = vmul.f32 %v2853_v2, %v1574_v62  ;;  %v2855_v12 = vpop.eup %2854 }
 0x765   :  { %v1594_v18 = vsub.f32 1.0, %v2855_v12  ;;  %v1596_v28 = vmul.f32 %v2855_v12, %v1431_v47 }
 0x766   :  { %v1592_v9 = vadd.f32 %v1591_v7, %v3214_v29 }
 0x768   :  { %2856 = vtanh.f32 %v1592_v9 }
 0x772   :  { %v2857_v20 = vpop.eup %2856 }
 0x773   :  { %v1595_v25 = vmul.f32 %v2857_v20, %v1594_v18 }
 0x775   :  { %v1597_v31 = vadd.f32 %v1596_v28, %v1595_v25 }
 0x777   :  { %1667 = vmatmul.mubr.f32.vlgmr.msra.gmra.mrb[14].mxu0 %v1597_v31  ;;  %2263 = vmatmul.mubr.f32.vlgmr.msra.gmra.mrb[22].mxu1 %v1597_v31 }
 0x84a   :  { %v1668_v35 = vpop.f32.mrb[14].mxu0  ;;  %v1739_v38 = vpop.f32.mrb[22].mxu1 }
 0x84b   :  { %v2758_v42 = vadd.f32 %v3205_v13, %v1668_v35  ;;  %v1670_v10 = vpop.f32.mrb[15].mxu0  ;;  %v2264_v50 = vpop.f32.mrb[23].mxu1  ;;  %v1740_v4 = vadd.f32 %v1739_v38, %v3217_v45 }
 0x84c   :  { %v2760_v58 = vadd.f32 %v3209_v19, %v1670_v10 }
 0x84d   :  { %v1815_v55 = vmul.f32 -1.442695, %v2758_v42 }
 0x84e   :  { %v1816_v29 = vmul.f32 -1.442695, %v2760_v58 }
 0x84f   :  { %2858 = vpow2.f32 %v1815_v55 }
 0x850   :  { %2860 = vpow2.f32 %v1816_v29 }
 0x859   :  { %v2859_v59 = vpop.eup %2858 }
 0x85a   :  { %v1747_v1 = vadd.f32 1.0, %v2859_v59  ;;  %v2861_v3 = vpop.eup %2860 }
 0x85b   :  { %v1754_v52 = vadd.f32 1.0, %v2861_v3 }
 0x85c   :  { %2862 = vrcp.f32 %v1747_v1 }
 0x85d   :  { %2864 = vrcp.f32 %v1754_v52 }
 0x866   :  { %v2863_v5 = vpop.eup %2862 }
 0x867   :  { %v1757_v6 = vmul.f32 %v2863_v5, %v1740_v4  ;;  %v2865_v8 = vpop.eup %2864 }
 0x868   :  { %v1760_v14 = vsub.f32 1.0, %v2865_v8  ;;  %v1762_v15 = vmul.f32 %v2865_v8, %v1597_v31 }
 0x869   :  { %v1758_v13 = vadd.f32 %v1757_v6, %v3211_v23 }
 0x86b   :  { %2866 = vtanh.f32 %v1758_v13 }
 0x875   :  { %v2867_v11 = vpop.eup %2866 }
 0x876   :  { %v1761_v19 = vmul.f32 %v2867_v11, %v1760_v14 }
 0x878   :  { %v1763_v46 = vadd.f32 %v1762_v15, %v1761_v19 }
 0x87a   :  { %1768 = vst [vmem:[#allocation10] sm:$0xff] %v1763_v46 }
 0x87b   :  { %2945 = shalt.err (!%p2942_p0)
}
 0x87c   :  { %s2946_s12 = scalar_lea.hbm %s3473_s5, 128 }
 0x87d   :  { %p2947_p1 = scmp.ne.s32.totalorder %s3473_s5, %s2946_s12  ;;  %p2950_p2 = scmp.lt.u32.totalorder %s2946_s12, %s3473_s5 }
 0x87f   :  { %p2952_p3 = pnand %p2950_p2, %p2947_p1 }
 0x881   :  { %2955 = shalt.err (!%p2952_p3)
}
 0x882   :  { %1778 = dma.vmem_to_hbm [thread:$0]  %s1776_s4, 128, %s3473_s5, [#allocation6]  }
 0x883   :  { %2960 = dma.done.wait [#allocation6], 128  }
 0x884   :  { %2961 = vsyncadd [#allocation6], 4294967168 }
 0x885   :  { %1782 = vsyncpa [#allocation5], 1 }
 0x886   :  { %1783 = vsyncpa [#allocation8], 1 }
 0x887   :  { %1784 = vsyncpa [#allocation6], 1 }

</bundles_post_ra>
